<compile_context>
chip_gen: v7x
topology: tpu7x:2x2x1
jax: 0.10.0
libtpu: 0.0.40
codegen_flags: <defaults>
</compile_context>

<pallas_src>
import functools

import jax
import jax.numpy as jnp
from jax import lax
from jax.experimental import pallas as pl
from jax.experimental.pallas import tpu as pltpu


# ---------------------------------------------------------------------------
# Fused encoder kernel: one grid step == one batch block, all layers inside.
# ---------------------------------------------------------------------------
def _encoder_kernel(x_ref,
                    qkv_w_ref, qkv_b_ref, out_w_ref, out_b_ref,
                    ff1_w_ref, ff1_b_ref, ff2_w_ref, ff2_b_ref,
                    ln1_g_ref, ln1_b_ref, ln2_g_ref, ln2_b_ref,
                    o_ref, *, n_layers, n_head, prenorm, scale):
    x = x_ref[...]                        # (t, H) f32, one batch block
    t, H = x.shape
    dh = H // n_head

    def ln(z, g, b):
        mu = jnp.mean(z, axis=-1, keepdims=True)
        var = jnp.mean((z - mu) ** 2, axis=-1, keepdims=True)   # biased, like torch
        return (z - mu) * lax.rsqrt(var + 1e-5) * g + b

    for l in range(n_layers):             # unrolled: weights are VMEM-resident
        qkv_w = qkv_w_ref[l]              # (H, 3H)
        qkv_b = qkv_b_ref[l]              # (1, 3H)
        out_w = out_w_ref[l]              # (H, H)
        out_b = out_b_ref[l]              # (1, H)
        ff1_w = ff1_w_ref[l]              # (H, 2H)
        ff1_b = ff1_b_ref[l]              # (1, 2H)
        ff2_w = ff2_w_ref[l]              # (2H, H)
        ff2_b = ff2_b_ref[l]              # (1, H)
        ln1_g, ln1_b = ln1_g_ref[l], ln1_b_ref[l]
        ln2_g, ln2_b = ln2_g_ref[l], ln2_b_ref[l]

        # --- self-attention block (per-batch, no mask needed) ---
        residual = x
        h = ln(x, ln1_g, ln1_b) if prenorm else x
        qkv = jnp.dot(h, qkv_w, preferred_element_type=jnp.float32) + qkv_b
        q = qkv[:, :H] * scale            # softmax scale folded into q
        k = qkv[:, H:2 * H]
        v = qkv[:, 2 * H:]

        acc = jnp.zeros((t, H), jnp.float32)
        for hh in range(n_head):          # unrolled; out-proj folded per head
            lo = hh * dh
            qh = q[:, lo:lo + dh]
            kh = k[:, lo:lo + dh]
            vh = v[:, lo:lo + dh]
            # (t, dh) x (t, dh) contracting the head dim -> (t, t); no transpose op.
            logits = lax.dot_general(qh, kh, (((1,), (1,)), ((), ())),
                                     preferred_element_type=jnp.float32)
            mx = jnp.max(logits, axis=-1, keepdims=True)
            p = jnp.exp(logits - mx)
            probs = p * pl.reciprocal(jnp.sum(p, axis=-1, keepdims=True))
            head = jnp.dot(probs, vh, preferred_element_type=jnp.float32)
            # fold output projection: out_w rows are sublane-aligned (dh == 8)
            acc = acc + jnp.dot(head, out_w[lo:lo + dh, :],
                                preferred_element_type=jnp.float32)
        attn = acc + out_b

        x = residual + attn
        if not prenorm:
            x = ln(x, ln1_g, ln1_b)

        # --- position-wise FF block ---
        residual = x
        h = ln(x, ln2_g, ln2_b) if prenorm else x
        h = jnp.maximum(
            jnp.dot(h, ff1_w, preferred_element_type=jnp.float32) + ff1_b, 0.0)
        h = jnp.dot(h, ff2_w, preferred_element_type=jnp.float32) + ff2_b
        x = residual + h
        if not prenorm:                   # post-norm FF LayerNorm (bug fix)
            x = ln(x, ln2_g, ln2_b)

    o_ref[...] = x


# ---------------------------------------------------------------------------
# Wrapper: one pallas_call, grid over independent batch blocks.
# ---------------------------------------------------------------------------
def transformer_encoder(x, params_list, n_head, prenorm, scale):
    """x: (t, n, H) f32, seq-first like the PyTorch module."""
    t, n, H = x.shape
    L = len(params_list)

    # Batch-major flatten: rows [b*t, (b+1)*t) belong to batch b.
    x_bm = jnp.transpose(x, (1, 0, 2)).reshape(n * t, H)

    def stacked(name, shape):
        return jnp.stack([p[name] for p in params_list]).reshape((L,) + shape)

    weights = [
        stacked("qkv_w", (H, 3 * H)), stacked("qkv_b", (1, 3 * H)),
        stacked("out_w", (H, H)),     stacked("out_b", (1, H)),
        stacked("ff1_w", (H, 2 * H)), stacked("ff1_b", (1, 2 * H)),
        stacked("ff2_w", (2 * H, H)), stacked("ff2_b", (1, H)),
        stacked("attn_ln_g", (1, H)), stacked("attn_ln_b", (1, H)),
        stacked("ff_ln_g", (1, H)),   stacked("ff_ln_b", (1, H)),
    ]

    kern = functools.partial(_encoder_kernel, n_layers=L, n_head=n_head,
                             prenorm=prenorm, scale=scale)

    # Whole stacked weight arrays as single VMEM blocks (constant index_map
    # => resident across batch grid steps, no per-step re-DMA).
    w_specs = [pl.BlockSpec(w.shape, lambda b: (0, 0, 0)) for w in weights]

    out = pl.pallas_call(
        kern,
        out_shape=jax.ShapeDtypeStruct((n * t, H), jnp.float32),
        grid=(n,),
        in_specs=[pl.BlockSpec((t, H), lambda b: (b, 0))] + w_specs,
        out_specs=pl.BlockSpec((t, H), lambda b: (b, 0)),
        compiler_params=pltpu.CompilerParams(
            dimension_semantics=("parallel",),   # batch blocks are independent
            vmem_limit_bytes=32 * 1024 * 1024),
    )(x_bm, *weights)

    return jnp.transpose(out.reshape(n, t, H), (1, 0, 2))


# ---------------------------------------------------------------------------
# Parameter init (mimics torch Linear uniform(+-1/sqrt(fan_in)))
# ---------------------------------------------------------------------------
def init_layer_params(key, hidden_size):
    H = hidden_size
    ks = jax.random.split(key, 8)

    def lin(kw, kb, fan_in, fan_out):
        bound = 1.0 / jnp.sqrt(fan_in)
        w = jax.random.uniform(kw, (fan_in, fan_out), jnp.float32, -bound, bound)
        b = jax.random.uniform(kb, (fan_out,), jnp.float32, -bound, bound)
        return w, b

    qkv_w, qkv_b = lin(ks[0], ks[1], H, 3 * H)
    out_w, out_b = lin(ks[2], ks[3], H, H)
    ff1_w, ff1_b = lin(ks[4], ks[5], H, 2 * H)
    ff2_w, ff2_b = lin(ks[6], ks[7], 2 * H, H)
    return dict(
        qkv_w=qkv_w, qkv_b=qkv_b,
        out_w=out_w, out_b=out_b,
        ff1_w=ff1_w, ff1_b=ff1_b,
        ff2_w=ff2_w, ff2_b=ff2_b,
        attn_ln_g=jnp.ones((H,), jnp.float32), attn_ln_b=jnp.zeros((H,), jnp.float32),
        ff_ln_g=jnp.ones((H,), jnp.float32), ff_ln_b=jnp.zeros((H,), jnp.float32),
    )


# ---------------------------------------------------------------------------
# Pure-JAX reference (mirrors the PyTorch forward exactly)
# ---------------------------------------------------------------------------
def _ref_layer(x, p, n_head, prenorm, scale):
    t, n, H = x.shape
    dh = H // n_head

    def ln(z, g, b):
        mu = jnp.mean(z, axis=-1, keepdims=True)
        var = jnp.mean((z - mu) ** 2, axis=-1, keepdims=True)
        return (z - mu) / jnp.sqrt(var + 1e-5) * g + b

    residual = x
    h = ln(x, p["attn_ln_g"], p["attn_ln_b"]) if prenorm else x
    qkv = h @ p["qkv_w"] + p["qkv_b"]
    q, k, v = jnp.split(qkv, 3, axis=2)
    q = q.reshape(t, n, n_head, dh)
    k = k.reshape(t, n, n_head, dh)
    v = v.reshape(t, n, n_head, dh)
    logits = jnp.einsum("ibhd,jbhd->ijbh", q, k)
    probs = jax.nn.softmax(logits * scale, axis=1)
    attn = jnp.einsum("ijbh,jbhd->ibhd", probs, v).reshape(t, n, H)
    attn = attn @ p["out_w"] + p["out_b"]
    x = residual + attn
    if not prenorm:
        x = ln(x, p["attn_ln_g"], p["attn_ln_b"])

    residual = x
    h = ln(x, p["ff_ln_g"], p["ff_ln_b"]) if prenorm else x
    h = jnp.maximum(h @ p["ff1_w"] + p["ff1_b"], 0.0)
    h = h @ p["ff2_w"] + p["ff2_b"]
    x = residual + h
    if not prenorm:
        x = ln(x, p["ff_ln_g"], p["ff_ln_b"])
    return x


def _ref_encoder(x, params_list, n_head, prenorm, scale):
    for p in params_list:
        x = _ref_layer(x, p, n_head, prenorm, scale)
    return x


# ---------------------------------------------------------------------------
if __name__ == "__main__":
    hidden_size = 32
    n_head = 4
    n_layers = 2
    d_head = hidden_size // n_head
    # Faithful to the module's buffer: 1.0 / hidden_size ** d_head
    scale = float(1.0 / (hidden_size ** d_head))

    t, n = 8, 2  # (seq_len, batch)

    key = jax.random.PRNGKey(0)
    kx, *layer_keys = jax.random.split(key, n_layers + 1)
    x = jax.random.normal(kx, (t, n, hidden_size), jnp.float32)
    params_list = [init_layer_params(k, hidden_size) for k in layer_keys]

    for prenorm in (True, False):          # exercise pre- and post-norm paths
        fwd = jax.jit(functools.partial(transformer_encoder, n_head=n_head,
                                        prenorm=prenorm, scale=scale))
        out = jax.block_until_ready(fwd(x, params_list))
        ref = _ref_encoder(x, params_list, n_head, prenorm, scale)
        assert out.shape == (t, n, hidden_size)
        assert jnp.allclose(out, ref, rtol=1e-4, atol=1e-4), \
            f"mismatch vs JAX reference (prenorm={prenorm})"

    print("KERNEL_OK")
</pallas_src>

<mosaic_0001>
module attributes {stable_mosaic.version = 11 : i64} {
  func.func @_encoder_kernel(%arg0: i32, %arg1: memref<8x32xf32, #tpu.memory_space<vmem>>, %arg2: memref<2x32x96xf32, #tpu.memory_space<vmem>>, %arg3: memref<2x1x96xf32, #tpu.memory_space<vmem>>, %arg4: memref<2x32x32xf32, #tpu.memory_space<vmem>>, %arg5: memref<2x1x32xf32, #tpu.memory_space<vmem>>, %arg6: memref<2x32x64xf32, #tpu.memory_space<vmem>>, %arg7: memref<2x1x64xf32, #tpu.memory_space<vmem>>, %arg8: memref<2x64x32xf32, #tpu.memory_space<vmem>>, %arg9: memref<2x1x32xf32, #tpu.memory_space<vmem>>, %arg10: memref<2x1x32xf32, #tpu.memory_space<vmem>>, %arg11: memref<2x1x32xf32, #tpu.memory_space<vmem>>, %arg12: memref<2x1x32xf32, #tpu.memory_space<vmem>>, %arg13: memref<2x1x32xf32, #tpu.memory_space<vmem>>, %arg14: memref<8x32xf32, #tpu.memory_space<vmem>>) attributes {dimension_semantics = [#tpu.dimension_semantics<parallel>], iteration_bounds = array<i64: 2>, scalar_prefetch = 0 : i64, scratch_operands = 0 : i64, tpu.core_type = #tpu.core_type<tc>, window_params = [{transform_indices = @transform_0, window_bounds = array<i64: 8, 32>}, {pipeline_mode = #tpu.pipeline_mode<synchronous>, transform_indices = @transform_1, window_bounds = array<i64: 2, 32, 96>}, {pipeline_mode = #tpu.pipeline_mode<synchronous>, transform_indices = @transform_2, window_bounds = array<i64: 2, 1, 96>}, {pipeline_mode = #tpu.pipeline_mode<synchronous>, transform_indices = @transform_3, window_bounds = array<i64: 2, 32, 32>}, {pipeline_mode = #tpu.pipeline_mode<synchronous>, transform_indices = @transform_4, window_bounds = array<i64: 2, 1, 32>}, {pipeline_mode = #tpu.pipeline_mode<synchronous>, transform_indices = @transform_5, window_bounds = array<i64: 2, 32, 64>}, {pipeline_mode = #tpu.pipeline_mode<synchronous>, transform_indices = @transform_6, window_bounds = array<i64: 2, 1, 64>}, {pipeline_mode = #tpu.pipeline_mode<synchronous>, transform_indices = @transform_7, window_bounds = array<i64: 2, 64, 32>}, {pipeline_mode = #tpu.pipeline_mode<synchronous>, transform_indices = @transform_8, window_bounds = array<i64: 2, 1, 32>}, {pipeline_mode = #tpu.pipeline_mode<synchronous>, transform_indices = @transform_9, window_bounds = array<i64: 2, 1, 32>}, {pipeline_mode = #tpu.pipeline_mode<synchronous>, transform_indices = @transform_10, window_bounds = array<i64: 2, 1, 32>}, {pipeline_mode = #tpu.pipeline_mode<synchronous>, transform_indices = @transform_11, window_bounds = array<i64: 2, 1, 32>}, {pipeline_mode = #tpu.pipeline_mode<synchronous>, transform_indices = @transform_12, window_bounds = array<i64: 2, 1, 32>}, {transform_indices = @transform_13, window_bounds = array<i64: 8, 32>}]} {
    %c0 = arith.constant 0 : index
    %c0_0 = arith.constant 0 : index
    %0 = vector.load %arg1[%c0, %c0_0] : memref<8x32xf32, #tpu.memory_space<vmem>>, vector<8x32xf32>
    %c0_1 = arith.constant 0 : index
    %c0_2 = arith.constant 0 : index
    %c0_3 = arith.constant 0 : index
    %1 = vector.load %arg2[%c0_1, %c0_2, %c0_3] : memref<2x32x96xf32, #tpu.memory_space<vmem>>, vector<1x32x96xf32>
    %2 = vector.shape_cast %1 : vector<1x32x96xf32> to vector<32x96xf32>
    %c0_4 = arith.constant 0 : index
    %c0_5 = arith.constant 0 : index
    %c0_6 = arith.constant 0 : index
    %3 = vector.load %arg3[%c0_4, %c0_5, %c0_6] : memref<2x1x96xf32, #tpu.memory_space<vmem>>, vector<1x1x96xf32>
    %4 = vector.shape_cast %3 : vector<1x1x96xf32> to vector<1x96xf32>
    %c0_7 = arith.constant 0 : index
    %c0_8 = arith.constant 0 : index
    %c0_9 = arith.constant 0 : index
    %5 = vector.load %arg4[%c0_7, %c0_8, %c0_9] : memref<2x32x32xf32, #tpu.memory_space<vmem>>, vector<1x32x32xf32>
    %6 = vector.shape_cast %5 : vector<1x32x32xf32> to vector<32x32xf32>
    %c0_10 = arith.constant 0 : index
    %c0_11 = arith.constant 0 : index
    %c0_12 = arith.constant 0 : index
    %7 = vector.load %arg5[%c0_10, %c0_11, %c0_12] : memref<2x1x32xf32, #tpu.memory_space<vmem>>, vector<1x1x32xf32>
    %8 = vector.shape_cast %7 : vector<1x1x32xf32> to vector<1x32xf32>
    %c0_13 = arith.constant 0 : index
    %c0_14 = arith.constant 0 : index
    %c0_15 = arith.constant 0 : index
    %9 = vector.load %arg6[%c0_13, %c0_14, %c0_15] : memref<2x32x64xf32, #tpu.memory_space<vmem>>, vector<1x32x64xf32>
    %10 = vector.shape_cast %9 : vector<1x32x64xf32> to vector<32x64xf32>
    %c0_16 = arith.constant 0 : index
    %c0_17 = arith.constant 0 : index
    %c0_18 = arith.constant 0 : index
    %11 = vector.load %arg7[%c0_16, %c0_17, %c0_18] : memref<2x1x64xf32, #tpu.memory_space<vmem>>, vector<1x1x64xf32>
    %12 = vector.shape_cast %11 : vector<1x1x64xf32> to vector<1x64xf32>
    %c0_19 = arith.constant 0 : index
    %c0_20 = arith.constant 0 : index
    %c0_21 = arith.constant 0 : index
    %13 = vector.load %arg8[%c0_19, %c0_20, %c0_21] : memref<2x64x32xf32, #tpu.memory_space<vmem>>, vector<1x64x32xf32>
    %14 = vector.shape_cast %13 : vector<1x64x32xf32> to vector<64x32xf32>
    %c0_22 = arith.constant 0 : index
    %c0_23 = arith.constant 0 : index
    %c0_24 = arith.constant 0 : index
    %15 = vector.load %arg9[%c0_22, %c0_23, %c0_24] : memref<2x1x32xf32, #tpu.memory_space<vmem>>, vector<1x1x32xf32>
    %16 = vector.shape_cast %15 : vector<1x1x32xf32> to vector<1x32xf32>
    %c0_25 = arith.constant 0 : index
    %c0_26 = arith.constant 0 : index
    %c0_27 = arith.constant 0 : index
    %17 = vector.load %arg10[%c0_25, %c0_26, %c0_27] : memref<2x1x32xf32, #tpu.memory_space<vmem>>, vector<1x1x32xf32>
    %18 = vector.shape_cast %17 : vector<1x1x32xf32> to vector<1x32xf32>
    %c0_28 = arith.constant 0 : index
    %c0_29 = arith.constant 0 : index
    %c0_30 = arith.constant 0 : index
    %19 = vector.load %arg11[%c0_28, %c0_29, %c0_30] : memref<2x1x32xf32, #tpu.memory_space<vmem>>, vector<1x1x32xf32>
    %20 = vector.shape_cast %19 : vector<1x1x32xf32> to vector<1x32xf32>
    %c0_31 = arith.constant 0 : index
    %c0_32 = arith.constant 0 : index
    %c0_33 = arith.constant 0 : index
    %21 = vector.load %arg12[%c0_31, %c0_32, %c0_33] : memref<2x1x32xf32, #tpu.memory_space<vmem>>, vector<1x1x32xf32>
    %22 = vector.shape_cast %21 : vector<1x1x32xf32> to vector<1x32xf32>
    %c0_34 = arith.constant 0 : index
    %c0_35 = arith.constant 0 : index
    %c0_36 = arith.constant 0 : index
    %23 = vector.load %arg13[%c0_34, %c0_35, %c0_36] : memref<2x1x32xf32, #tpu.memory_space<vmem>>, vector<1x1x32xf32>
    %24 = vector.shape_cast %23 : vector<1x1x32xf32> to vector<1x32xf32>
    %cst = arith.constant dense<0.000000e+00> : vector<8xf32>
    %25 = vector.multi_reduction <add>, %0, %cst [1] : vector<8x32xf32> to vector<8xf32>
    %26 = vector.shape_cast %25 : vector<8xf32> to vector<8x1xf32>
    %cst_37 = arith.constant 3.200000e+01 : f32
    %27 = vector.broadcast %cst_37 : f32 to vector<8x1xf32>
    %28 = arith.divf %26, %27 : vector<8x1xf32>
    %29 = vector.broadcast %28 : vector<8x1xf32> to vector<8x32xf32>
    %30 = arith.subf %0, %29 : vector<8x32xf32>
    %31 = arith.mulf %30, %30 : vector<8x32xf32>
    %cst_38 = arith.constant dense<0.000000e+00> : vector<8xf32>
    %32 = vector.multi_reduction <add>, %31, %cst_38 [1] : vector<8x32xf32> to vector<8xf32>
    %33 = vector.shape_cast %32 : vector<8xf32> to vector<8x1xf32>
    %cst_39 = arith.constant 3.200000e+01 : f32
    %34 = vector.broadcast %cst_39 : f32 to vector<8x1xf32>
    %35 = arith.divf %33, %34 : vector<8x1xf32>
    %36 = vector.broadcast %28 : vector<8x1xf32> to vector<8x32xf32>
    %37 = arith.subf %0, %36 : vector<8x32xf32>
    %cst_40 = arith.constant 9.99999974E-6 : f32
    %38 = vector.broadcast %cst_40 : f32 to vector<8x1xf32>
    %39 = arith.addf %35, %38 : vector<8x1xf32>
    %40 = math.rsqrt %39 : vector<8x1xf32>
    %41 = vector.broadcast %40 : vector<8x1xf32> to vector<8x32xf32>
    %42 = arith.mulf %37, %41 : vector<8x32xf32>
    %43 = vector.broadcast %18 : vector<1x32xf32> to vector<8x32xf32>
    %44 = arith.mulf %42, %43 : vector<8x32xf32>
    %45 = vector.broadcast %20 : vector<1x32xf32> to vector<8x32xf32>
    %46 = arith.addf %44, %45 : vector<8x32xf32>
    %cst_41 = arith.constant dense<0.000000e+00> : vector<8x96xf32>
    %47 = tpu.matmul %46, %2, %cst_41 {dimension_numbers = #tpu.dot_dimension_numbers<[1], [0], [0], [1], [0, 0, 1, 1], [], []>} : vector<8x32xf32>, vector<32x96xf32>, vector<8x96xf32> -> vector<8x96xf32>
    %48 = vector.broadcast %4 : vector<1x96xf32> to vector<8x96xf32>
    %49 = arith.addf %47, %48 : vector<8x96xf32>
    %50 = vector.extract_strided_slice %49 {offsets = [0, 0], sizes = [8, 32], strides = [1, 1]} : vector<8x96xf32> to vector<8x32xf32>
    %cst_42 = arith.constant 9.09494702E-13 : f32
    %51 = vector.broadcast %cst_42 : f32 to vector<8x32xf32>
    %52 = arith.mulf %50, %51 : vector<8x32xf32>
    %53 = vector.extract_strided_slice %49 {offsets = [0, 32], sizes = [8, 32], strides = [1, 1]} : vector<8x96xf32> to vector<8x32xf32>
    %54 = vector.extract_strided_slice %49 {offsets = [0, 64], sizes = [8, 32], strides = [1, 1]} : vector<8x96xf32> to vector<8x32xf32>
    %cst_43 = arith.constant 0.000000e+00 : f32
    %55 = vector.broadcast %cst_43 : f32 to vector<8x32xf32>
    %56 = vector.extract_strided_slice %52 {offsets = [0, 0], sizes = [8, 8], strides = [1, 1]} : vector<8x32xf32> to vector<8x8xf32>
    %57 = vector.extract_strided_slice %53 {offsets = [0, 0], sizes = [8, 8], strides = [1, 1]} : vector<8x32xf32> to vector<8x8xf32>
    %58 = vector.extract_strided_slice %54 {offsets = [0, 0], sizes = [8, 8], strides = [1, 1]} : vector<8x32xf32> to vector<8x8xf32>
    %cst_44 = arith.constant dense<0.000000e+00> : vector<8x8xf32>
    %59 = tpu.matmul %56, %57, %cst_44 {dimension_numbers = #tpu.dot_dimension_numbers<[1], [1], [0], [0], [0, 0, 1, 0], [], []>} : vector<8x8xf32>, vector<8x8xf32>, vector<8x8xf32> -> vector<8x8xf32>
    %cst_45 = arith.constant dense<0xFF800000> : vector<8xf32>
    %60 = vector.multi_reduction <maximumf>, %59, %cst_45 [1] : vector<8x8xf32> to vector<8xf32>
    %61 = vector.shape_cast %60 : vector<8xf32> to vector<8x1xf32>
    %62 = vector.broadcast %61 : vector<8x1xf32> to vector<8x8xf32>
    %63 = arith.subf %59, %62 : vector<8x8xf32>
    %64 = math.exp %63 : vector<8x8xf32>
    %cst_46 = arith.constant dense<0.000000e+00> : vector<8xf32>
    %65 = vector.multi_reduction <add>, %64, %cst_46 [1] : vector<8x8xf32> to vector<8xf32>
    %66 = vector.shape_cast %65 : vector<8xf32> to vector<8x1xf32>
    %67 = tpu.reciprocal %66 : vector<8x1xf32> -> vector<8x1xf32>
    %68 = vector.broadcast %67 : vector<8x1xf32> to vector<8x8xf32>
    %69 = arith.mulf %64, %68 : vector<8x8xf32>
    %cst_47 = arith.constant dense<0.000000e+00> : vector<8x8xf32>
    %70 = tpu.matmul %69, %58, %cst_47 {dimension_numbers = #tpu.dot_dimension_numbers<[1], [0], [0], [1], [0, 0, 1, 1], [], []>} : vector<8x8xf32>, vector<8x8xf32>, vector<8x8xf32> -> vector<8x8xf32>
    %71 = vector.extract_strided_slice %6 {offsets = [0, 0], sizes = [8, 32], strides = [1, 1]} : vector<32x32xf32> to vector<8x32xf32>
    %cst_48 = arith.constant dense<0.000000e+00> : vector<8x32xf32>
    %72 = tpu.matmul %70, %71, %cst_48 {dimension_numbers = #tpu.dot_dimension_numbers<[1], [0], [0], [1], [0, 0, 1, 1], [], []>} : vector<8x8xf32>, vector<8x32xf32>, vector<8x32xf32> -> vector<8x32xf32>
    %73 = arith.addf %55, %72 : vector<8x32xf32>
    %74 = vector.extract_strided_slice %52 {offsets = [0, 8], sizes = [8, 8], strides = [1, 1]} : vector<8x32xf32> to vector<8x8xf32>
    %75 = vector.extract_strided_slice %53 {offsets = [0, 8], sizes = [8, 8], strides = [1, 1]} : vector<8x32xf32> to vector<8x8xf32>
    %76 = vector.extract_strided_slice %54 {offsets = [0, 8], sizes = [8, 8], strides = [1, 1]} : vector<8x32xf32> to vector<8x8xf32>
    %cst_49 = arith.constant dense<0.000000e+00> : vector<8x8xf32>
    %77 = tpu.matmul %74, %75, %cst_49 {dimension_numbers = #tpu.dot_dimension_numbers<[1], [1], [0], [0], [0, 0, 1, 0], [], []>} : vector<8x8xf32>, vector<8x8xf32>, vector<8x8xf32> -> vector<8x8xf32>
    %cst_50 = arith.constant dense<0xFF800000> : vector<8xf32>
    %78 = vector.multi_reduction <maximumf>, %77, %cst_50 [1] : vector<8x8xf32> to vector<8xf32>
    %79 = vector.shape_cast %78 : vector<8xf32> to vector<8x1xf32>
    %80 = vector.broadcast %79 : vector<8x1xf32> to vector<8x8xf32>
    %81 = arith.subf %77, %80 : vector<8x8xf32>
    %82 = math.exp %81 : vector<8x8xf32>
    %cst_51 = arith.constant dense<0.000000e+00> : vector<8xf32>
    %83 = vector.multi_reduction <add>, %82, %cst_51 [1] : vector<8x8xf32> to vector<8xf32>
    %84 = vector.shape_cast %83 : vector<8xf32> to vector<8x1xf32>
    %85 = tpu.reciprocal %84 : vector<8x1xf32> -> vector<8x1xf32>
    %86 = vector.broadcast %85 : vector<8x1xf32> to vector<8x8xf32>
    %87 = arith.mulf %82, %86 : vector<8x8xf32>
    %cst_52 = arith.constant dense<0.000000e+00> : vector<8x8xf32>
    %88 = tpu.matmul %87, %76, %cst_52 {dimension_numbers = #tpu.dot_dimension_numbers<[1], [0], [0], [1], [0, 0, 1, 1], [], []>} : vector<8x8xf32>, vector<8x8xf32>, vector<8x8xf32> -> vector<8x8xf32>
    %89 = vector.extract_strided_slice %6 {offsets = [8, 0], sizes = [8, 32], strides = [1, 1]} : vector<32x32xf32> to vector<8x32xf32>
    %cst_53 = arith.constant dense<0.000000e+00> : vector<8x32xf32>
    %90 = tpu.matmul %88, %89, %cst_53 {dimension_numbers = #tpu.dot_dimension_numbers<[1], [0], [0], [1], [0, 0, 1, 1], [], []>} : vector<8x8xf32>, vector<8x32xf32>, vector<8x32xf32> -> vector<8x32xf32>
    %91 = arith.addf %73, %90 : vector<8x32xf32>
    %92 = vector.extract_strided_slice %52 {offsets = [0, 16], sizes = [8, 8], strides = [1, 1]} : vector<8x32xf32> to vector<8x8xf32>
    %93 = vector.extract_strided_slice %53 {offsets = [0, 16], sizes = [8, 8], strides = [1, 1]} : vector<8x32xf32> to vector<8x8xf32>
    %94 = vector.extract_strided_slice %54 {offsets = [0, 16], sizes = [8, 8], strides = [1, 1]} : vector<8x32xf32> to vector<8x8xf32>
    %cst_54 = arith.constant dense<0.000000e+00> : vector<8x8xf32>
    %95 = tpu.matmul %92, %93, %cst_54 {dimension_numbers = #tpu.dot_dimension_numbers<[1], [1], [0], [0], [0, 0, 1, 0], [], []>} : vector<8x8xf32>, vector<8x8xf32>, vector<8x8xf32> -> vector<8x8xf32>
    %cst_55 = arith.constant dense<0xFF800000> : vector<8xf32>
    %96 = vector.multi_reduction <maximumf>, %95, %cst_55 [1] : vector<8x8xf32> to vector<8xf32>
    %97 = vector.shape_cast %96 : vector<8xf32> to vector<8x1xf32>
    %98 = vector.broadcast %97 : vector<8x1xf32> to vector<8x8xf32>
    %99 = arith.subf %95, %98 : vector<8x8xf32>
    %100 = math.exp %99 : vector<8x8xf32>
    %cst_56 = arith.constant dense<0.000000e+00> : vector<8xf32>
    %101 = vector.multi_reduction <add>, %100, %cst_56 [1] : vector<8x8xf32> to vector<8xf32>
    %102 = vector.shape_cast %101 : vector<8xf32> to vector<8x1xf32>
    %103 = tpu.reciprocal %102 : vector<8x1xf32> -> vector<8x1xf32>
    %104 = vector.broadcast %103 : vector<8x1xf32> to vector<8x8xf32>
    %105 = arith.mulf %100, %104 : vector<8x8xf32>
    %cst_57 = arith.constant dense<0.000000e+00> : vector<8x8xf32>
    %106 = tpu.matmul %105, %94, %cst_57 {dimension_numbers = #tpu.dot_dimension_numbers<[1], [0], [0], [1], [0, 0, 1, 1], [], []>} : vector<8x8xf32>, vector<8x8xf32>, vector<8x8xf32> -> vector<8x8xf32>
    %107 = vector.extract_strided_slice %6 {offsets = [16, 0], sizes = [8, 32], strides = [1, 1]} : vector<32x32xf32> to vector<8x32xf32>
    %cst_58 = arith.constant dense<0.000000e+00> : vector<8x32xf32>
    %108 = tpu.matmul %106, %107, %cst_58 {dimension_numbers = #tpu.dot_dimension_numbers<[1], [0], [0], [1], [0, 0, 1, 1], [], []>} : vector<8x8xf32>, vector<8x32xf32>, vector<8x32xf32> -> vector<8x32xf32>
    %109 = arith.addf %91, %108 : vector<8x32xf32>
    %110 = vector.extract_strided_slice %52 {offsets = [0, 24], sizes = [8, 8], strides = [1, 1]} : vector<8x32xf32> to vector<8x8xf32>
    %111 = vector.extract_strided_slice %53 {offsets = [0, 24], sizes = [8, 8], strides = [1, 1]} : vector<8x32xf32> to vector<8x8xf32>
    %112 = vector.extract_strided_slice %54 {offsets = [0, 24], sizes = [8, 8], strides = [1, 1]} : vector<8x32xf32> to vector<8x8xf32>
    %cst_59 = arith.constant dense<0.000000e+00> : vector<8x8xf32>
    %113 = tpu.matmul %110, %111, %cst_59 {dimension_numbers = #tpu.dot_dimension_numbers<[1], [1], [0], [0], [0, 0, 1, 0], [], []>} : vector<8x8xf32>, vector<8x8xf32>, vector<8x8xf32> -> vector<8x8xf32>
    %cst_60 = arith.constant dense<0xFF800000> : vector<8xf32>
    %114 = vector.multi_reduction <maximumf>, %113, %cst_60 [1] : vector<8x8xf32> to vector<8xf32>
    %115 = vector.shape_cast %114 : vector<8xf32> to vector<8x1xf32>
    %116 = vector.broadcast %115 : vector<8x1xf32> to vector<8x8xf32>
    %117 = arith.subf %113, %116 : vector<8x8xf32>
    %118 = math.exp %117 : vector<8x8xf32>
    %cst_61 = arith.constant dense<0.000000e+00> : vector<8xf32>
    %119 = vector.multi_reduction <add>, %118, %cst_61 [1] : vector<8x8xf32> to vector<8xf32>
    %120 = vector.shape_cast %119 : vector<8xf32> to vector<8x1xf32>
    %121 = tpu.reciprocal %120 : vector<8x1xf32> -> vector<8x1xf32>
    %122 = vector.broadcast %121 : vector<8x1xf32> to vector<8x8xf32>
    %123 = arith.mulf %118, %122 : vector<8x8xf32>
    %cst_62 = arith.constant dense<0.000000e+00> : vector<8x8xf32>
    %124 = tpu.matmul %123, %112, %cst_62 {dimension_numbers = #tpu.dot_dimension_numbers<[1], [0], [0], [1], [0, 0, 1, 1], [], []>} : vector<8x8xf32>, vector<8x8xf32>, vector<8x8xf32> -> vector<8x8xf32>
    %125 = vector.extract_strided_slice %6 {offsets = [24, 0], sizes = [8, 32], strides = [1, 1]} : vector<32x32xf32> to vector<8x32xf32>
    %cst_63 = arith.constant dense<0.000000e+00> : vector<8x32xf32>
    %126 = tpu.matmul %124, %125, %cst_63 {dimension_numbers = #tpu.dot_dimension_numbers<[1], [0], [0], [1], [0, 0, 1, 1], [], []>} : vector<8x8xf32>, vector<8x32xf32>, vector<8x32xf32> -> vector<8x32xf32>
    %127 = arith.addf %109, %126 : vector<8x32xf32>
    %128 = vector.broadcast %8 : vector<1x32xf32> to vector<8x32xf32>
    %129 = arith.addf %127, %128 : vector<8x32xf32>
    %130 = arith.addf %0, %129 : vector<8x32xf32>
    %cst_64 = arith.constant dense<0.000000e+00> : vector<8xf32>
    %131 = vector.multi_reduction <add>, %130, %cst_64 [1] : vector<8x32xf32> to vector<8xf32>
    %132 = vector.shape_cast %131 : vector<8xf32> to vector<8x1xf32>
    %cst_65 = arith.constant 3.200000e+01 : f32
    %133 = vector.broadcast %cst_65 : f32 to vector<8x1xf32>
    %134 = arith.divf %132, %133 : vector<8x1xf32>
    %135 = vector.broadcast %134 : vector<8x1xf32> to vector<8x32xf32>
    %136 = arith.subf %130, %135 : vector<8x32xf32>
    %137 = arith.mulf %136, %136 : vector<8x32xf32>
    %cst_66 = arith.constant dense<0.000000e+00> : vector<8xf32>
    %138 = vector.multi_reduction <add>, %137, %cst_66 [1] : vector<8x32xf32> to vector<8xf32>
    %139 = vector.shape_cast %138 : vector<8xf32> to vector<8x1xf32>
    %cst_67 = arith.constant 3.200000e+01 : f32
    %140 = vector.broadcast %cst_67 : f32 to vector<8x1xf32>
    %141 = arith.divf %139, %140 : vector<8x1xf32>
    %142 = vector.broadcast %134 : vector<8x1xf32> to vector<8x32xf32>
    %143 = arith.subf %130, %142 : vector<8x32xf32>
    %cst_68 = arith.constant 9.99999974E-6 : f32
    %144 = vector.broadcast %cst_68 : f32 to vector<8x1xf32>
    %145 = arith.addf %141, %144 : vector<8x1xf32>
    %146 = math.rsqrt %145 : vector<8x1xf32>
    %147 = vector.broadcast %146 : vector<8x1xf32> to vector<8x32xf32>
    %148 = arith.mulf %143, %147 : vector<8x32xf32>
    %149 = vector.broadcast %22 : vector<1x32xf32> to vector<8x32xf32>
    %150 = arith.mulf %148, %149 : vector<8x32xf32>
    %151 = vector.broadcast %24 : vector<1x32xf32> to vector<8x32xf32>
    %152 = arith.addf %150, %151 : vector<8x32xf32>
    %cst_69 = arith.constant dense<0.000000e+00> : vector<8x64xf32>
    %153 = tpu.matmul %152, %10, %cst_69 {dimension_numbers = #tpu.dot_dimension_numbers<[1], [0], [0], [1], [0, 0, 1, 1], [], []>} : vector<8x32xf32>, vector<32x64xf32>, vector<8x64xf32> -> vector<8x64xf32>
    %154 = vector.broadcast %12 : vector<1x64xf32> to vector<8x64xf32>
    %155 = arith.addf %153, %154 : vector<8x64xf32>
    %cst_70 = arith.constant 0.000000e+00 : f32
    %156 = vector.broadcast %cst_70 : f32 to vector<8x64xf32>
    %157 = arith.maximumf %155, %156 : vector<8x64xf32>
    %cst_71 = arith.constant dense<0.000000e+00> : vector<8x32xf32>
    %158 = tpu.matmul %157, %14, %cst_71 {dimension_numbers = #tpu.dot_dimension_numbers<[1], [0], [0], [1], [0, 0, 1, 1], [], []>} : vector<8x64xf32>, vector<64x32xf32>, vector<8x32xf32> -> vector<8x32xf32>
    %159 = vector.broadcast %16 : vector<1x32xf32> to vector<8x32xf32>
    %160 = arith.addf %158, %159 : vector<8x32xf32>
    %161 = arith.addf %130, %160 : vector<8x32xf32>
    %c1 = arith.constant 1 : index
    %c0_72 = arith.constant 0 : index
    %c0_73 = arith.constant 0 : index
    %162 = vector.load %arg2[%c1, %c0_72, %c0_73] : memref<2x32x96xf32, #tpu.memory_space<vmem>>, vector<1x32x96xf32>
    %163 = vector.shape_cast %162 : vector<1x32x96xf32> to vector<32x96xf32>
    %c1_74 = arith.constant 1 : index
    %c0_75 = arith.constant 0 : index
    %c0_76 = arith.constant 0 : index
    %164 = vector.load %arg3[%c1_74, %c0_75, %c0_76] : memref<2x1x96xf32, #tpu.memory_space<vmem>>, vector<1x1x96xf32>
    %165 = vector.shape_cast %164 : vector<1x1x96xf32> to vector<1x96xf32>
    %c1_77 = arith.constant 1 : index
    %c0_78 = arith.constant 0 : index
    %c0_79 = arith.constant 0 : index
    %166 = vector.load %arg4[%c1_77, %c0_78, %c0_79] : memref<2x32x32xf32, #tpu.memory_space<vmem>>, vector<1x32x32xf32>
    %167 = vector.shape_cast %166 : vector<1x32x32xf32> to vector<32x32xf32>
    %c1_80 = arith.constant 1 : index
    %c0_81 = arith.constant 0 : index
    %c0_82 = arith.constant 0 : index
    %168 = vector.load %arg5[%c1_80, %c0_81, %c0_82] : memref<2x1x32xf32, #tpu.memory_space<vmem>>, vector<1x1x32xf32>
    %169 = vector.shape_cast %168 : vector<1x1x32xf32> to vector<1x32xf32>
    %c1_83 = arith.constant 1 : index
    %c0_84 = arith.constant 0 : index
    %c0_85 = arith.constant 0 : index
    %170 = vector.load %arg6[%c1_83, %c0_84, %c0_85] : memref<2x32x64xf32, #tpu.memory_space<vmem>>, vector<1x32x64xf32>
    %171 = vector.shape_cast %170 : vector<1x32x64xf32> to vector<32x64xf32>
    %c1_86 = arith.constant 1 : index
    %c0_87 = arith.constant 0 : index
    %c0_88 = arith.constant 0 : index
    %172 = vector.load %arg7[%c1_86, %c0_87, %c0_88] : memref<2x1x64xf32, #tpu.memory_space<vmem>>, vector<1x1x64xf32>
    %173 = vector.shape_cast %172 : vector<1x1x64xf32> to vector<1x64xf32>
    %c1_89 = arith.constant 1 : index
    %c0_90 = arith.constant 0 : index
    %c0_91 = arith.constant 0 : index
    %174 = vector.load %arg8[%c1_89, %c0_90, %c0_91] : memref<2x64x32xf32, #tpu.memory_space<vmem>>, vector<1x64x32xf32>
    %175 = vector.shape_cast %174 : vector<1x64x32xf32> to vector<64x32xf32>
    %c1_92 = arith.constant 1 : index
    %c0_93 = arith.constant 0 : index
    %c0_94 = arith.constant 0 : index
    %176 = vector.load %arg9[%c1_92, %c0_93, %c0_94] : memref<2x1x32xf32, #tpu.memory_space<vmem>>, vector<1x1x32xf32>
    %177 = vector.shape_cast %176 : vector<1x1x32xf32> to vector<1x32xf32>
    %c1_95 = arith.constant 1 : index
    %c0_96 = arith.constant 0 : index
    %c0_97 = arith.constant 0 : index
    %178 = vector.load %arg10[%c1_95, %c0_96, %c0_97] : memref<2x1x32xf32, #tpu.memory_space<vmem>>, vector<1x1x32xf32>
    %179 = vector.shape_cast %178 : vector<1x1x32xf32> to vector<1x32xf32>
    %c1_98 = arith.constant 1 : index
    %c0_99 = arith.constant 0 : index
    %c0_100 = arith.constant 0 : index
    %180 = vector.load %arg11[%c1_98, %c0_99, %c0_100] : memref<2x1x32xf32, #tpu.memory_space<vmem>>, vector<1x1x32xf32>
    %181 = vector.shape_cast %180 : vector<1x1x32xf32> to vector<1x32xf32>
    %c1_101 = arith.constant 1 : index
    %c0_102 = arith.constant 0 : index
    %c0_103 = arith.constant 0 : index
    %182 = vector.load %arg12[%c1_101, %c0_102, %c0_103] : memref<2x1x32xf32, #tpu.memory_space<vmem>>, vector<1x1x32xf32>
    %183 = vector.shape_cast %182 : vector<1x1x32xf32> to vector<1x32xf32>
    %c1_104 = arith.constant 1 : index
    %c0_105 = arith.constant 0 : index
    %c0_106 = arith.constant 0 : index
    %184 = vector.load %arg13[%c1_104, %c0_105, %c0_106] : memref<2x1x32xf32, #tpu.memory_space<vmem>>, vector<1x1x32xf32>
    %185 = vector.shape_cast %184 : vector<1x1x32xf32> to vector<1x32xf32>
    %cst_107 = arith.constant dense<0.000000e+00> : vector<8xf32>
    %186 = vector.multi_reduction <add>, %161, %cst_107 [1] : vector<8x32xf32> to vector<8xf32>
    %187 = vector.shape_cast %186 : vector<8xf32> to vector<8x1xf32>
    %cst_108 = arith.constant 3.200000e+01 : f32
    %188 = vector.broadcast %cst_108 : f32 to vector<8x1xf32>
    %189 = arith.divf %187, %188 : vector<8x1xf32>
    %190 = vector.broadcast %189 : vector<8x1xf32> to vector<8x32xf32>
    %191 = arith.subf %161, %190 : vector<8x32xf32>
    %192 = arith.mulf %191, %191 : vector<8x32xf32>
    %cst_109 = arith.constant dense<0.000000e+00> : vector<8xf32>
    %193 = vector.multi_reduction <add>, %192, %cst_109 [1] : vector<8x32xf32> to vector<8xf32>
    %194 = vector.shape_cast %193 : vector<8xf32> to vector<8x1xf32>
    %cst_110 = arith.constant 3.200000e+01 : f32
    %195 = vector.broadcast %cst_110 : f32 to vector<8x1xf32>
    %196 = arith.divf %194, %195 : vector<8x1xf32>
    %197 = vector.broadcast %189 : vector<8x1xf32> to vector<8x32xf32>
    %198 = arith.subf %161, %197 : vector<8x32xf32>
    %cst_111 = arith.constant 9.99999974E-6 : f32
    %199 = vector.broadcast %cst_111 : f32 to vector<8x1xf32>
    %200 = arith.addf %196, %199 : vector<8x1xf32>
    %201 = math.rsqrt %200 : vector<8x1xf32>
    %202 = vector.broadcast %201 : vector<8x1xf32> to vector<8x32xf32>
    %203 = arith.mulf %198, %202 : vector<8x32xf32>
    %204 = vector.broadcast %179 : vector<1x32xf32> to vector<8x32xf32>
    %205 = arith.mulf %203, %204 : vector<8x32xf32>
    %206 = vector.broadcast %181 : vector<1x32xf32> to vector<8x32xf32>
    %207 = arith.addf %205, %206 : vector<8x32xf32>
    %cst_112 = arith.constant dense<0.000000e+00> : vector<8x96xf32>
    %208 = tpu.matmul %207, %163, %cst_112 {dimension_numbers = #tpu.dot_dimension_numbers<[1], [0], [0], [1], [0, 0, 1, 1], [], []>} : vector<8x32xf32>, vector<32x96xf32>, vector<8x96xf32> -> vector<8x96xf32>
    %209 = vector.broadcast %165 : vector<1x96xf32> to vector<8x96xf32>
    %210 = arith.addf %208, %209 : vector<8x96xf32>
    %211 = vector.extract_strided_slice %210 {offsets = [0, 0], sizes = [8, 32], strides = [1, 1]} : vector<8x96xf32> to vector<8x32xf32>
    %cst_113 = arith.constant 9.09494702E-13 : f32
    %212 = vector.broadcast %cst_113 : f32 to vector<8x32xf32>
    %213 = arith.mulf %211, %212 : vector<8x32xf32>
    %214 = vector.extract_strided_slice %210 {offsets = [0, 32], sizes = [8, 32], strides = [1, 1]} : vector<8x96xf32> to vector<8x32xf32>
    %215 = vector.extract_strided_slice %210 {offsets = [0, 64], sizes = [8, 32], strides = [1, 1]} : vector<8x96xf32> to vector<8x32xf32>
    %cst_114 = arith.constant 0.000000e+00 : f32
    %216 = vector.broadcast %cst_114 : f32 to vector<8x32xf32>
    %217 = vector.extract_strided_slice %213 {offsets = [0, 0], sizes = [8, 8], strides = [1, 1]} : vector<8x32xf32> to vector<8x8xf32>
    %218 = vector.extract_strided_slice %214 {offsets = [0, 0], sizes = [8, 8], strides = [1, 1]} : vector<8x32xf32> to vector<8x8xf32>
    %219 = vector.extract_strided_slice %215 {offsets = [0, 0], sizes = [8, 8], strides = [1, 1]} : vector<8x32xf32> to vector<8x8xf32>
    %cst_115 = arith.constant dense<0.000000e+00> : vector<8x8xf32>
    %220 = tpu.matmul %217, %218, %cst_115 {dimension_numbers = #tpu.dot_dimension_numbers<[1], [1], [0], [0], [0, 0, 1, 0], [], []>} : vector<8x8xf32>, vector<8x8xf32>, vector<8x8xf32> -> vector<8x8xf32>
    %cst_116 = arith.constant dense<0xFF800000> : vector<8xf32>
    %221 = vector.multi_reduction <maximumf>, %220, %cst_116 [1] : vector<8x8xf32> to vector<8xf32>
    %222 = vector.shape_cast %221 : vector<8xf32> to vector<8x1xf32>
    %223 = vector.broadcast %222 : vector<8x1xf32> to vector<8x8xf32>
    %224 = arith.subf %220, %223 : vector<8x8xf32>
    %225 = math.exp %224 : vector<8x8xf32>
    %cst_117 = arith.constant dense<0.000000e+00> : vector<8xf32>
    %226 = vector.multi_reduction <add>, %225, %cst_117 [1] : vector<8x8xf32> to vector<8xf32>
    %227 = vector.shape_cast %226 : vector<8xf32> to vector<8x1xf32>
    %228 = tpu.reciprocal %227 : vector<8x1xf32> -> vector<8x1xf32>
    %229 = vector.broadcast %228 : vector<8x1xf32> to vector<8x8xf32>
    %230 = arith.mulf %225, %229 : vector<8x8xf32>
    %cst_118 = arith.constant dense<0.000000e+00> : vector<8x8xf32>
    %231 = tpu.matmul %230, %219, %cst_118 {dimension_numbers = #tpu.dot_dimension_numbers<[1], [0], [0], [1], [0, 0, 1, 1], [], []>} : vector<8x8xf32>, vector<8x8xf32>, vector<8x8xf32> -> vector<8x8xf32>
    %232 = vector.extract_strided_slice %167 {offsets = [0, 0], sizes = [8, 32], strides = [1, 1]} : vector<32x32xf32> to vector<8x32xf32>
    %cst_119 = arith.constant dense<0.000000e+00> : vector<8x32xf32>
    %233 = tpu.matmul %231, %232, %cst_119 {dimension_numbers = #tpu.dot_dimension_numbers<[1], [0], [0], [1], [0, 0, 1, 1], [], []>} : vector<8x8xf32>, vector<8x32xf32>, vector<8x32xf32> -> vector<8x32xf32>
    %234 = arith.addf %216, %233 : vector<8x32xf32>
    %235 = vector.extract_strided_slice %213 {offsets = [0, 8], sizes = [8, 8], strides = [1, 1]} : vector<8x32xf32> to vector<8x8xf32>
    %236 = vector.extract_strided_slice %214 {offsets = [0, 8], sizes = [8, 8], strides = [1, 1]} : vector<8x32xf32> to vector<8x8xf32>
    %237 = vector.extract_strided_slice %215 {offsets = [0, 8], sizes = [8, 8], strides = [1, 1]} : vector<8x32xf32> to vector<8x8xf32>
    %cst_120 = arith.constant dense<0.000000e+00> : vector<8x8xf32>
    %238 = tpu.matmul %235, %236, %cst_120 {dimension_numbers = #tpu.dot_dimension_numbers<[1], [1], [0], [0], [0, 0, 1, 0], [], []>} : vector<8x8xf32>, vector<8x8xf32>, vector<8x8xf32> -> vector<8x8xf32>
    %cst_121 = arith.constant dense<0xFF800000> : vector<8xf32>
    %239 = vector.multi_reduction <maximumf>, %238, %cst_121 [1] : vector<8x8xf32> to vector<8xf32>
    %240 = vector.shape_cast %239 : vector<8xf32> to vector<8x1xf32>
    %241 = vector.broadcast %240 : vector<8x1xf32> to vector<8x8xf32>
    %242 = arith.subf %238, %241 : vector<8x8xf32>
    %243 = math.exp %242 : vector<8x8xf32>
    %cst_122 = arith.constant dense<0.000000e+00> : vector<8xf32>
    %244 = vector.multi_reduction <add>, %243, %cst_122 [1] : vector<8x8xf32> to vector<8xf32>
    %245 = vector.shape_cast %244 : vector<8xf32> to vector<8x1xf32>
    %246 = tpu.reciprocal %245 : vector<8x1xf32> -> vector<8x1xf32>
    %247 = vector.broadcast %246 : vector<8x1xf32> to vector<8x8xf32>
    %248 = arith.mulf %243, %247 : vector<8x8xf32>
    %cst_123 = arith.constant dense<0.000000e+00> : vector<8x8xf32>
    %249 = tpu.matmul %248, %237, %cst_123 {dimension_numbers = #tpu.dot_dimension_numbers<[1], [0], [0], [1], [0, 0, 1, 1], [], []>} : vector<8x8xf32>, vector<8x8xf32>, vector<8x8xf32> -> vector<8x8xf32>
    %250 = vector.extract_strided_slice %167 {offsets = [8, 0], sizes = [8, 32], strides = [1, 1]} : vector<32x32xf32> to vector<8x32xf32>
    %cst_124 = arith.constant dense<0.000000e+00> : vector<8x32xf32>
    %251 = tpu.matmul %249, %250, %cst_124 {dimension_numbers = #tpu.dot_dimension_numbers<[1], [0], [0], [1], [0, 0, 1, 1], [], []>} : vector<8x8xf32>, vector<8x32xf32>, vector<8x32xf32> -> vector<8x32xf32>
    %252 = arith.addf %234, %251 : vector<8x32xf32>
    %253 = vector.extract_strided_slice %213 {offsets = [0, 16], sizes = [8, 8], strides = [1, 1]} : vector<8x32xf32> to vector<8x8xf32>
    %254 = vector.extract_strided_slice %214 {offsets = [0, 16], sizes = [8, 8], strides = [1, 1]} : vector<8x32xf32> to vector<8x8xf32>
    %255 = vector.extract_strided_slice %215 {offsets = [0, 16], sizes = [8, 8], strides = [1, 1]} : vector<8x32xf32> to vector<8x8xf32>
    %cst_125 = arith.constant dense<0.000000e+00> : vector<8x8xf32>
    %256 = tpu.matmul %253, %254, %cst_125 {dimension_numbers = #tpu.dot_dimension_numbers<[1], [1], [0], [0], [0, 0, 1, 0], [], []>} : vector<8x8xf32>, vector<8x8xf32>, vector<8x8xf32> -> vector<8x8xf32>
    %cst_126 = arith.constant dense<0xFF800000> : vector<8xf32>
    %257 = vector.multi_reduction <maximumf>, %256, %cst_126 [1] : vector<8x8xf32> to vector<8xf32>
    %258 = vector.shape_cast %257 : vector<8xf32> to vector<8x1xf32>
    %259 = vector.broadcast %258 : vector<8x1xf32> to vector<8x8xf32>
    %260 = arith.subf %256, %259 : vector<8x8xf32>
    %261 = math.exp %260 : vector<8x8xf32>
    %cst_127 = arith.constant dense<0.000000e+00> : vector<8xf32>
    %262 = vector.multi_reduction <add>, %261, %cst_127 [1] : vector<8x8xf32> to vector<8xf32>
    %263 = vector.shape_cast %262 : vector<8xf32> to vector<8x1xf32>
    %264 = tpu.reciprocal %263 : vector<8x1xf32> -> vector<8x1xf32>
    %265 = vector.broadcast %264 : vector<8x1xf32> to vector<8x8xf32>
    %266 = arith.mulf %261, %265 : vector<8x8xf32>
    %cst_128 = arith.constant dense<0.000000e+00> : vector<8x8xf32>
    %267 = tpu.matmul %266, %255, %cst_128 {dimension_numbers = #tpu.dot_dimension_numbers<[1], [0], [0], [1], [0, 0, 1, 1], [], []>} : vector<8x8xf32>, vector<8x8xf32>, vector<8x8xf32> -> vector<8x8xf32>
    %268 = vector.extract_strided_slice %167 {offsets = [16, 0], sizes = [8, 32], strides = [1, 1]} : vector<32x32xf32> to vector<8x32xf32>
    %cst_129 = arith.constant dense<0.000000e+00> : vector<8x32xf32>
    %269 = tpu.matmul %267, %268, %cst_129 {dimension_numbers = #tpu.dot_dimension_numbers<[1], [0], [0], [1], [0, 0, 1, 1], [], []>} : vector<8x8xf32>, vector<8x32xf32>, vector<8x32xf32> -> vector<8x32xf32>
    %270 = arith.addf %252, %269 : vector<8x32xf32>
    %271 = vector.extract_strided_slice %213 {offsets = [0, 24], sizes = [8, 8], strides = [1, 1]} : vector<8x32xf32> to vector<8x8xf32>
    %272 = vector.extract_strided_slice %214 {offsets = [0, 24], sizes = [8, 8], strides = [1, 1]} : vector<8x32xf32> to vector<8x8xf32>
    %273 = vector.extract_strided_slice %215 {offsets = [0, 24], sizes = [8, 8], strides = [1, 1]} : vector<8x32xf32> to vector<8x8xf32>
    %cst_130 = arith.constant dense<0.000000e+00> : vector<8x8xf32>
    %274 = tpu.matmul %271, %272, %cst_130 {dimension_numbers = #tpu.dot_dimension_numbers<[1], [1], [0], [0], [0, 0, 1, 0], [], []>} : vector<8x8xf32>, vector<8x8xf32>, vector<8x8xf32> -> vector<8x8xf32>
    %cst_131 = arith.constant dense<0xFF800000> : vector<8xf32>
    %275 = vector.multi_reduction <maximumf>, %274, %cst_131 [1] : vector<8x8xf32> to vector<8xf32>
    %276 = vector.shape_cast %275 : vector<8xf32> to vector<8x1xf32>
    %277 = vector.broadcast %276 : vector<8x1xf32> to vector<8x8xf32>
    %278 = arith.subf %274, %277 : vector<8x8xf32>
    %279 = math.exp %278 : vector<8x8xf32>
    %cst_132 = arith.constant dense<0.000000e+00> : vector<8xf32>
    %280 = vector.multi_reduction <add>, %279, %cst_132 [1] : vector<8x8xf32> to vector<8xf32>
    %281 = vector.shape_cast %280 : vector<8xf32> to vector<8x1xf32>
    %282 = tpu.reciprocal %281 : vector<8x1xf32> -> vector<8x1xf32>
    %283 = vector.broadcast %282 : vector<8x1xf32> to vector<8x8xf32>
    %284 = arith.mulf %279, %283 : vector<8x8xf32>
    %cst_133 = arith.constant dense<0.000000e+00> : vector<8x8xf32>
    %285 = tpu.matmul %284, %273, %cst_133 {dimension_numbers = #tpu.dot_dimension_numbers<[1], [0], [0], [1], [0, 0, 1, 1], [], []>} : vector<8x8xf32>, vector<8x8xf32>, vector<8x8xf32> -> vector<8x8xf32>
    %286 = vector.extract_strided_slice %167 {offsets = [24, 0], sizes = [8, 32], strides = [1, 1]} : vector<32x32xf32> to vector<8x32xf32>
    %cst_134 = arith.constant dense<0.000000e+00> : vector<8x32xf32>
    %287 = tpu.matmul %285, %286, %cst_134 {dimension_numbers = #tpu.dot_dimension_numbers<[1], [0], [0], [1], [0, 0, 1, 1], [], []>} : vector<8x8xf32>, vector<8x32xf32>, vector<8x32xf32> -> vector<8x32xf32>
    %288 = arith.addf %270, %287 : vector<8x32xf32>
    %289 = vector.broadcast %169 : vector<1x32xf32> to vector<8x32xf32>
    %290 = arith.addf %288, %289 : vector<8x32xf32>
    %291 = arith.addf %161, %290 : vector<8x32xf32>
    %cst_135 = arith.constant dense<0.000000e+00> : vector<8xf32>
    %292 = vector.multi_reduction <add>, %291, %cst_135 [1] : vector<8x32xf32> to vector<8xf32>
    %293 = vector.shape_cast %292 : vector<8xf32> to vector<8x1xf32>
    %cst_136 = arith.constant 3.200000e+01 : f32
    %294 = vector.broadcast %cst_136 : f32 to vector<8x1xf32>
    %295 = arith.divf %293, %294 : vector<8x1xf32>
    %296 = vector.broadcast %295 : vector<8x1xf32> to vector<8x32xf32>
    %297 = arith.subf %291, %296 : vector<8x32xf32>
    %298 = arith.mulf %297, %297 : vector<8x32xf32>
    %cst_137 = arith.constant dense<0.000000e+00> : vector<8xf32>
    %299 = vector.multi_reduction <add>, %298, %cst_137 [1] : vector<8x32xf32> to vector<8xf32>
    %300 = vector.shape_cast %299 : vector<8xf32> to vector<8x1xf32>
    %cst_138 = arith.constant 3.200000e+01 : f32
    %301 = vector.broadcast %cst_138 : f32 to vector<8x1xf32>
    %302 = arith.divf %300, %301 : vector<8x1xf32>
    %303 = vector.broadcast %295 : vector<8x1xf32> to vector<8x32xf32>
    %304 = arith.subf %291, %303 : vector<8x32xf32>
    %cst_139 = arith.constant 9.99999974E-6 : f32
    %305 = vector.broadcast %cst_139 : f32 to vector<8x1xf32>
    %306 = arith.addf %302, %305 : vector<8x1xf32>
    %307 = math.rsqrt %306 : vector<8x1xf32>
    %308 = vector.broadcast %307 : vector<8x1xf32> to vector<8x32xf32>
    %309 = arith.mulf %304, %308 : vector<8x32xf32>
    %310 = vector.broadcast %183 : vector<1x32xf32> to vector<8x32xf32>
    %311 = arith.mulf %309, %310 : vector<8x32xf32>
    %312 = vector.broadcast %185 : vector<1x32xf32> to vector<8x32xf32>
    %313 = arith.addf %311, %312 : vector<8x32xf32>
    %cst_140 = arith.constant dense<0.000000e+00> : vector<8x64xf32>
    %314 = tpu.matmul %313, %171, %cst_140 {dimension_numbers = #tpu.dot_dimension_numbers<[1], [0], [0], [1], [0, 0, 1, 1], [], []>} : vector<8x32xf32>, vector<32x64xf32>, vector<8x64xf32> -> vector<8x64xf32>
    %315 = vector.broadcast %173 : vector<1x64xf32> to vector<8x64xf32>
    %316 = arith.addf %314, %315 : vector<8x64xf32>
    %cst_141 = arith.constant 0.000000e+00 : f32
    %317 = vector.broadcast %cst_141 : f32 to vector<8x64xf32>
    %318 = arith.maximumf %316, %317 : vector<8x64xf32>
    %cst_142 = arith.constant dense<0.000000e+00> : vector<8x32xf32>
    %319 = tpu.matmul %318, %175, %cst_142 {dimension_numbers = #tpu.dot_dimension_numbers<[1], [0], [0], [1], [0, 0, 1, 1], [], []>} : vector<8x64xf32>, vector<64x32xf32>, vector<8x32xf32> -> vector<8x32xf32>
    %320 = vector.broadcast %177 : vector<1x32xf32> to vector<8x32xf32>
    %321 = arith.addf %319, %320 : vector<8x32xf32>
    %322 = arith.addf %291, %321 : vector<8x32xf32>
    %c0_143 = arith.constant 0 : index
    %c0_144 = arith.constant 0 : index
    %323 = vector.load %arg14[%c0_143, %c0_144] : memref<8x32xf32, #tpu.memory_space<vmem>>, vector<8x32xf32>
    tpu.vector_store %arg14[%c0_143, %c0_144], %322 {strides = array<i32>} : memref<8x32xf32, #tpu.memory_space<vmem>>, vector<8x32xf32>,
    return
  }
  func.func @transform_0(%arg0: i32) -> (i32, i32) {
    %c0_i32 = arith.constant 0 : i32
    %c0_i32_0 = arith.constant 0 : i32
    return %arg0, %c0_i32 : i32, i32
  }
  func.func @transform_1(%arg0: i32) -> (i32, i32, i32) {
    %c0_i32 = arith.constant 0 : i32
    %c0_i32_0 = arith.constant 0 : i32
    %c0_i32_1 = arith.constant 0 : i32
    %c0_i32_2 = arith.constant 0 : i32
    return %c0_i32, %c0_i32_0, %c0_i32_1 : i32, i32, i32
  }
  func.func @transform_2(%arg0: i32) -> (i32, i32, i32) {
    %c0_i32 = arith.constant 0 : i32
    %c0_i32_0 = arith.constant 0 : i32
    %c0_i32_1 = arith.constant 0 : i32
    %c0_i32_2 = arith.constant 0 : i32
    return %c0_i32, %c0_i32_0, %c0_i32_1 : i32, i32, i32
  }
  func.func @transform_3(%arg0: i32) -> (i32, i32, i32) {
    %c0_i32 = arith.constant 0 : i32
    %c0_i32_0 = arith.constant 0 : i32
    %c0_i32_1 = arith.constant 0 : i32
    %c0_i32_2 = arith.constant 0 : i32
    return %c0_i32, %c0_i32_0, %c0_i32_1 : i32, i32, i32
  }
  func.func @transform_4(%arg0: i32) -> (i32, i32, i32) {
    %c0_i32 = arith.constant 0 : i32
    %c0_i32_0 = arith.constant 0 : i32
    %c0_i32_1 = arith.constant 0 : i32
    %c0_i32_2 = arith.constant 0 : i32
    return %c0_i32, %c0_i32_0, %c0_i32_1 : i32, i32, i32
  }
  func.func @transform_5(%arg0: i32) -> (i32, i32, i32) {
    %c0_i32 = arith.constant 0 : i32
    %c0_i32_0 = arith.constant 0 : i32
    %c0_i32_1 = arith.constant 0 : i32
    %c0_i32_2 = arith.constant 0 : i32
    return %c0_i32, %c0_i32_0, %c0_i32_1 : i32, i32, i32
  }
  func.func @transform_6(%arg0: i32) -> (i32, i32, i32) {
    %c0_i32 = arith.constant 0 : i32
    %c0_i32_0 = arith.constant 0 : i32
    %c0_i32_1 = arith.constant 0 : i32
    %c0_i32_2 = arith.constant 0 : i32
    return %c0_i32, %c0_i32_0, %c0_i32_1 : i32, i32, i32
  }
  func.func @transform_7(%arg0: i32) -> (i32, i32, i32) {
    %c0_i32 = arith.constant 0 : i32
    %c0_i32_0 = arith.constant 0 : i32
    %c0_i32_1 = arith.constant 0 : i32
    %c0_i32_2 = arith.constant 0 : i32
    return %c0_i32, %c0_i32_0, %c0_i32_1 : i32, i32, i32
  }
  func.func @transform_8(%arg0: i32) -> (i32, i32, i32) {
    %c0_i32 = arith.constant 0 : i32
    %c0_i32_0 = arith.constant 0 : i32
    %c0_i32_1 = arith.constant 0 : i32
    %c0_i32_2 = arith.constant 0 : i32
    return %c0_i32, %c0_i32_0, %c0_i32_1 : i32, i32, i32
  }
  func.func @transform_9(%arg0: i32) -> (i32, i32, i32) {
    %c0_i32 = arith.constant 0 : i32
    %c0_i32_0 = arith.constant 0 : i32
    %c0_i32_1 = arith.constant 0 : i32
    %c0_i32_2 = arith.constant 0 : i32
    return %c0_i32, %c0_i32_0, %c0_i32_1 : i32, i32, i32
  }
  func.func @transform_10(%arg0: i32) -> (i32, i32, i32) {
    %c0_i32 = arith.constant 0 : i32
    %c0_i32_0 = arith.constant 0 : i32
    %c0_i32_1 = arith.constant 0 : i32
    %c0_i32_2 = arith.constant 0 : i32
    return %c0_i32, %c0_i32_0, %c0_i32_1 : i32, i32, i32
  }
  func.func @transform_11(%arg0: i32) -> (i32, i32, i32) {
    %c0_i32 = arith.constant 0 : i32
    %c0_i32_0 = arith.constant 0 : i32
    %c0_i32_1 = arith.constant 0 : i32
    %c0_i32_2 = arith.constant 0 : i32
    return %c0_i32, %c0_i32_0, %c0_i32_1 : i32, i32, i32
  }
  func.func @transform_12(%arg0: i32) -> (i32, i32, i32) {
    %c0_i32 = arith.constant 0 : i32
    %c0_i32_0 = arith.constant 0 : i32
    %c0_i32_1 = arith.constant 0 : i32
    %c0_i32_2 = arith.constant 0 : i32
    return %c0_i32, %c0_i32_0, %c0_i32_1 : i32, i32, i32
  }
  func.func @transform_13(%arg0: i32) -> (i32, i32) {
    %c0_i32 = arith.constant 0 : i32
    %c0_i32_0 = arith.constant 0 : i32
    return %arg0, %c0_i32 : i32, i32
  }
}

</mosaic_0001>

<bundles_post_ra>
// kernel: transformer_encoder.1
= control target key start
LH: loop header
LB: loop body
LE: loop exit
PB: predicated region body
PF: predicated region fallthrough
CT: control target
= control target key end

     0   :  { %s3656_s25 = smov 0   ;;  %s4082_s0 = inlined_call_operand.vmem [shape: f32[16,32], index: 0, kind: input, shape index: {}]   ;;  %s4083_s1 = inlined_call_operand.vmem [shape: f32[2,32,96], index: 1, kind: input, shape index: {}]   ;;  %s4084_s2 = inlined_call_operand.vmem [shape: f32[2,1,96], index: 2, kind: input, shape index: {}]   ;;  %s4085_s3 = inlined_call_operand.vmem [shape: f32[2,32,32], index: 3, kind: input, shape index: {}]   ;;  %s4086_s4 = inlined_call_operand.vmem [shape: f32[2,1,32], index: 4, kind: input, shape index: {}]   ;;  %s4087_s5 = inlined_call_operand.vmem [shape: f32[2,32,64], index: 5, kind: input, shape index: {}]   ;;  %s4088_s6 = inlined_call_operand.vmem [shape: f32[2,1,64], index: 6, kind: input, shape index: {}]   ;;  %s4089_s7 = inlined_call_operand.vmem [shape: f32[2,64,32], index: 7, kind: input, shape index: {}]   ;;  %s4090_s8 = inlined_call_operand.vmem [shape: f32[2,1,32], index: 8, kind: input, shape index: {}]   ;;  %s4091_s9 = inlined_call_operand.vmem [shape: f32[2,1,32], index: 9, kind: input, shape index: {}]   ;;  %s4092_s10 = inlined_call_operand.vmem [shape: f32[2,1,32], index: 10, kind: input, shape index: {}]   ;;  %s4093_s11 = inlined_call_operand.vmem [shape: f32[2,1,32], index: 11, kind: input, shape index: {}]   ;;  %s4094_s12 = inlined_call_operand.vmem [shape: f32[2,1,32], index: 12, kind: input, shape index: {}]   ;;  %s4095_s13 = inlined_call_operand.vmem [shape: f32[16,32], index: 13, kind: output, shape index: {}]  }
   0x1 LB: > { %s3075_s26 = sadd.s32 4294967295, %s3570_s25   ;;  %p3079_p0 = scmp.ge.s32.totalorder %s3570_s25, 1  ;;  %s3570_s25 = sphi %s3656_s25, %s23_s25  }
   0x2   : > { %p386_p1 = scmp.lt.s32.totalorder %s3570_s25, 3 }
   0x4   : > { %p387_p2 = pnand %p3079_p0, %p386_p1 }
   0x5   : > { %p428_p3 = scmp.lt.s32.totalorder (!%p387_p2), %s3075_s26, 1  ;;  %vm465_vm0 = vcmask (!%p387_p2), 261120   ;;  %v437_v7 = vld [vmem:[%s4083_s1] sm:$0xff] (!%p387_p2)  ;;  %v438_v8 = vld [vmem:[%s4083_s1 + $0x8] sm:$0xff] (!%p387_p2)  ;;  %v439_v9 = vld [vmem:[%s4083_s1 + $0x10] sm:$0xff] (!%p387_p2)  ;;  %v3572_v10 = vmov (!%p387_p2), 0.0|0.0  }
   0x6   : > { %390 = sbr.rel (%p387_p2) target bundleno = 7262 (0x1c5e), region = 72  ;;  %3454 = vmatprep.subr.bf16.mxu0 (!%p387_p2), %v3572_v10  ;;  %v3455_v11 = vpack.c.bf16 (!%p387_p2), %v438_v8, %v437_v7  ;;  %v440_v12 = vld [vmem:[%s4083_s1 + $0x18] sm:$0xff] (!%p387_p2)  ;;  %vm3573_vm1 = vmmov (!%p387_p2), 0   ;;  %v3574_v13 = vmov (!%p387_p2), 0.0   ;;  %v3082_v19 = vld [vmem:[%s4091_s9] ss:$0 sm:$0xff] (!%p387_p2) }
   0x7   : > { %3260 = vmatprep.mubr.msk.f32.mxu0 (!%p387_p2), %vm3573_vm1, %v3574_v13  ;;  %3268 = vmatprep.subr.mxu1 (!%p387_p2), %v3574_v13  ;;  %v3458_v14 = vpack.c.bf16 (!%p387_p2), %v440_v12, %v439_v9  ;;  %v3083_v21 = vld [vmem:[%s4092_s10] ss:$0 sm:$0xff] (!%p387_p2)  ;;  %s3575_s14 = smov (!%p387_p2), 96   ;;  %s3576_s15 = smov (!%p387_p2), 120   ;;  %vm577_vm2 = vcmask (!%p387_p2), 64512   ;;  %v443_v48 = vld [vmem:[%s4085_s3 + $0x8] sm:$0xff] (!%p387_p2) }
   0x8   : > { %3270 = vmatprep.mubr.msk.f32.mxu1 (!%p387_p2), %vm3573_vm1, %v3574_v13  ;;  %3456 = vmatpush3.bf16.msra.mxu0 (!%p387_p2), %v3455_v11  ;;  %v3084_v24 = vld [vmem:[%s4084_s2] ss:$0 sm:$0xff] (!%p387_p2)  ;;  %s3577_s16 = smov (!%p387_p2), 88   ;;  %s3578_s17 = smov (!%p387_p2), 56   ;;  %vm1650_vm3 = vcmask (!%p387_p2), 523264  }
   0x9   : > { %3457 = vmatprep.subr.bf16.mxu0 (!%p387_p2), %v3572_v10  ;;  %s3579_s18 = smov (!%p387_p2), 64   ;;  %s3580_s19 = smov (!%p387_p2), 80   ;;  %v442_v57 = vld [vmem:[%s4085_s3] sm:$0xff] (!%p387_p2) }
   0xa   : > { %s4101_s20 = smov (!%p387_p2), 112   ;;  %s4098_s28 = smov (!%p387_p2), 48  }
   0xb   : > { %s4099_s29 = smov (!%p387_p2), 104   ;;  %s4097_s23 = smov (!%p387_p2), 40  }
   0xc   : > { %3459 = vmatpush3.bf16.msra.mxu0 (!%p387_p2), %v3458_v14  ;;  %s4105_s24 = smov (!%p387_p2), 48  }
   0xd   : > { %s4109_s26 = smov (!%p428_p3, %s3075_s26), 1  ;;  %3263 = vmatprep.subr.mxu0 %v3574_v13 }
   0xe   : > { %s4096_s27 = sshll.u32 %s4109_s26, 3 }
   0xf   : > { %s431_s30 = scalar_lea.vmem %s4082_s0, %s4096_s27  ;;  %s4104_s27 = smov 104  }
  0x10   : > { %v3672_v0 = vld [vmem:[%s431_s30] sm:$0xff]  ;;  %s4100_s30 = smov 72  }
  0x11   : > { %v466_v1 = vsel %vm465_vm0, %v3672_v0, 0.0 }
  0x12   : > { %467 = vadd.xlane.f32.xlu0 %v466_v1 }
  0x9f   : > { %v468_v2 = vpop.xlane.xlu0 %467 }
  0xa0   : > { %v470_v3 = vmul.f32 0.03125, %v468_v2 }
  0xa2   : > { %v471_v4 = vsub.f32 %v3672_v0, %v470_v3 }
  0xa4   : > { %v472_v5 = vmul.f32 %v471_v4, %v471_v4 }
  0xa6   : > { %v473_v6 = vsel %vm465_vm0, %v472_v5, 0.0 }
  0xa7   : > { %474 = vadd.xlane.f32.xlu0 %v473_v6 }
 0x134   : > { %v475_v15 = vpop.xlane.xlu0 %474 }
 0x135   : > { %v476_v16 = vmul.f32 0.03125, %v475_v15 }
 0x137   : > { %v477_v17 = vadd.f32 1e-05, %v476_v16 }
 0x139   : > { %3524 = vrsqrt.f32 %v477_v17 }
 0x143   : > { %v3525_v18 = vpop.eup %3524 }
 0x144   : > { %v479_v20 = vmul.f32 %v3525_v18, %v471_v4 }
 0x146   : > { %v486_v22 = vmul.f32 %v3082_v19, %v479_v20 }
 0x148   : > { %v493_v23 = vadd.f32 %v3083_v21, %v486_v22  ;;  %v444_v22 = vld [vmem:[%s4085_s3 + $0x10] sm:$0xff] }
 0x14a   : > { %3261 = vmatmul.mubr.msk.f32.vlgmr.msra.gmra.mrb[0].mxu0 %vm465_vm0, %v493_v23 }
 0x14b   : > { %3265 = vmatprep.mubr.msk.f32.mxu0 %vm3573_vm1, %v3574_v13 }
 0x21d   : > { %v569_v25 = vpop.f32.mrb[0].mxu0 }
 0x21e   : > { %v3710_v26 = vadd.f32 %v3084_v24, %v569_v25  ;;  %v3262_v27 = vpop.f32.mrb[1].mxu0 }
 0x220   : > { %575 = vrot.lane.b32.xlu1 %v3710_v26, %s3575_s14  ;;  %v3715_v28 = vmul.f32 9.094947e-13, %v3710_v26 }
 0x222   : > { %740 = vrot.lane.b32.xlu0 %v3715_v28, %s3576_s15 }
 0x224   : > { %742 = vrot.lane.b32.xlu1 %v3710_v26, %s3577_s16 }
 0x292   : > { %v576_v29 = vpop.permute.xlu1 %575 }
 0x293   : > { %3264 = vmatpush3.xpose.msk.msra.mxu0 %vm577_vm2, %v576_v29 }
 0x294   : > { %3273 = vmatprep.subr.mxu0 %v3574_v13  ;;  %v741_v31 = vpop.permute.xlu0 %740 }
 0x296   : > { %v743_v30 = vpop.permute.xlu1 %742  ;;  %3266 = vmatmul.mubr.msk.f32.vlgmr.msra.gmra.mrb[2].mxu0 %vm577_vm2, %v3715_v28 }
 0x297   : > { %3274 = vmatpush3.xpose.msk.msra.mxu0 %vm577_vm2, %v743_v30  ;;  %3275 = vmatprep.mubr.msk.f32.mxu0 %vm3573_vm1, %v3574_v13 }
 0x298   : > { %3283 = vmatprep.subr.mxu0 %v3574_v13 }
 0x29a   : > { %3276 = vmatmul.mubr.msk.f32.vlgmr.msra.gmra.mrb[4].mxu0 %vm577_vm2, %v741_v31 }
 0x29b   : > { %3285 = vmatprep.mubr.msk.f32.mxu0 %vm3573_vm1, %v3574_v13  ;;  %3284 = vmatpush3.msra.mxu0 %v443_v48 }
 0x29c   : > { %3293 = vmatprep.subr.mxu0 %v3574_v13 }
 0x369   : > { %v649_v32 = vpop.f32.mrb[2].mxu0 }
 0x36a   : > { %v3267_v33 = vpop.f32.mrb[3].mxu0  ;;  %v653_v34 = vsel %vm577_vm2, %v649_v32, -inf }
 0x36b   : > { %654 = vmax.xlane.f32.xlu1 %v653_v34  ;;  %v445_v34 = vld [vmem:[%s4085_s3 + $0x18] sm:$0xff] }
 0x36d   : > { %v814_v35 = vpop.f32.mrb[4].mxu0 }
 0x36e   : > { %v3277_v36 = vpop.f32.mrb[5].mxu0  ;;  %v818_v37 = vsel %vm577_vm2, %v814_v35, -inf }
 0x36f   : > { %819 = vmax.xlane.f32.xlu0 %v818_v37 }
 0x385   : > { %829 = vrot.lane.b32.xlu0 %v3710_v26, %s3578_s17 }
 0x3f8   : > { %v655_v38 = vpop.xlane.xlu1 %654 }
 0x3f9   : > { %v656_v39 = vsub.f32 %v649_v32, %v655_v38 }
 0x3fb   : > { %v657_v40 = vmul.f32 1.442695, %v656_v39 }
 0x3fc   : > { %v820_v41 = vpop.xlane.xlu0 %819 }
 0x3fd   : > { %3526 = vpow2.f32 %v657_v40  ;;  %v821_v42 = vsub.f32 %v814_v35, %v820_v41 }
 0x3ff   : > { %v822_v43 = vmul.f32 1.442695, %v821_v42 }
 0x400   : > { %v830_v54 = vpop.permute.xlu0 %829 }
 0x401   : > { %3528 = vpow2.f32 %v822_v43  ;;  %v3102_v43 = vld [vmem:[%s4086_s4] ss:$0 sm:$0xff] }
 0x407   : > { %v3527_v44 = vpop.eup %3526 }
 0x408   : > { %v659_v45 = vsel %vm577_vm2, %v3527_v44, 0.0 }
 0x409   : > { %660 = vadd.xlane.f32.xlu1 %v659_v45 }
 0x40b   : > { %v3529_v46 = vpop.eup %3528 }
 0x40c   : > { %v824_v47 = vsel %vm577_vm2, %v3529_v46, 0.0 }
 0x40d   : > { %825 = vadd.xlane.f32.xlu1 %v824_v47 }
 0x41e   : > { %664 = vrot.lane.b32.xlu1 %v3710_v26, %s3579_s18 }
 0x422   : > { %1053 = vrot.lane.b32.xlu1 %v3710_v26, %s3580_s19 }
 0x426   : > { %1051 = vrot.lane.b32.xlu1 %v3715_v28, %s4101_s20 }
 0x496   : > { %v661_v49 = vpop.xlane.xlu1 %660 }
 0x497   : > { %3530 = vrcp.f32 %v661_v49 }
 0x49a   : > { %v826_v50 = vpop.xlane.xlu1 %825 }
 0x49b   : > { %3532 = vrcp.f32 %v826_v50 }
 0x49e   : > { %v665_v51 = vpop.permute.xlu1 %664 }
 0x49f   : > { %3269 = vmatpush3.msra.mxu1 %v665_v51 }
 0x4a0   : > { %3278 = vmatprep.subr.mxu1 %v3574_v13 }
 0x4a1   : > { %v3531_v52 = vpop.eup %3530 }
 0x4a2   : > { %v663_v53 = vmul.f32 %v3531_v52, %v3527_v44  ;;  %v1054_v60 = vpop.permute.xlu1 %1053 }
 0x4a4   : > { %3271 = vmatmul.mubr.msk.f32.vlgmr.msra.gmra.mrb[0].mxu1 %vm577_vm2, %v663_v53 }
 0x4a5   : > { %v3533_v55 = vpop.eup %3532  ;;  %3279 = vmatpush3.msra.mxu1 %v830_v54  ;;  %3280 = vmatprep.mubr.msk.f32.mxu1 %vm3573_vm1, %v3574_v13 }
 0x4a6   : > { %v828_v56 = vmul.f32 %v3533_v55, %v3529_v46  ;;  %3288 = vmatprep.subr.mxu1 %v3574_v13  ;;  %v1052_v63 = vpop.permute.xlu1 %1051  ;;  %v447_v55 = vld [vmem:[%s4087_s5] sm:$0xff] }
 0x4a8   : > { %3281 = vmatmul.mubr.msk.f32.vlgmr.msra.gmra.mrb[2].mxu1 %vm577_vm2, %v828_v56 }
 0x4a9   : > { %3290 = vmatprep.mubr.msk.f32.mxu1 %vm3573_vm1, %v3574_v13  ;;  %3289 = vmatpush3.msra.mxu1 %v442_v57  ;;  %v449_v57 = vld [vmem:[%s4087_s5 + $0x10] sm:$0xff] }
 0x4aa   : > { %3298 = vmatprep.subr.mxu1 %v3574_v13 }
 0x577   : > { %v736_v58 = vpop.f32.mrb[0].mxu1 }
 0x578   : > { %v3272_v59 = vpop.f32.mrb[1].mxu1  ;;  %3291 = vmatmul.mubr.msk.f32.vlgmr.msra.gmra.mrb[4].mxu1 %vm577_vm2, %v736_v58  ;;  %v450_v58 = vld [vmem:[%s4087_s5 + $0x18] sm:$0xff] }
 0x579   : > { %3300 = vmatprep.mubr.msk.f32.mxu1 %vm3573_vm1, %v3574_v13  ;;  %v3464_v59 = vpack.c.bf16 %v450_v58, %v449_v57 }
 0x57b   : > { %v901_v61 = vpop.f32.mrb[2].mxu1 }
 0x57c   : > { %v3282_v62 = vpop.f32.mrb[3].mxu1  ;;  %3286 = vmatmul.mubr.msk.f32.vlgmr.msra.gmra.mrb[6].mxu0 %vm577_vm2, %v901_v61  ;;  %v453_v61 = vld [vmem:[%s4089_s7 + $0x8] sm:$0xff] }
 0x57d   : > { %3294 = vmatpush3.xpose.msk.msra.mxu0 %vm577_vm2, %v1054_v60  ;;  %3295 = vmatprep.mubr.msk.f32.mxu0 %vm3573_vm1, %v3574_v13  ;;  %v452_v60 = vld [vmem:[%s4089_s7] sm:$0xff]  ;;  %v454_v62 = vld [vmem:[%s4089_s7 + $0x10] sm:$0xff] }
 0x57e   : > { %3303 = vmatprep.subr.mxu0 %v3574_v13 }
 0x580   : > { %3296 = vmatmul.mubr.msk.f32.vlgmr.msra.gmra.mrb[8].mxu0 %vm577_vm2, %v1052_v63  ;;  %v3467_v63 = vpack.c.bf16 %v453_v61, %v452_v60 }
 0x581   : > { %3305 = vmatprep.mubr.msk.f32.mxu0 %vm3573_vm1, %v3574_v13  ;;  %3304 = vmatpush3.msra.mxu0 %v444_v22 }
 0x582   : > { %3313 = vmatprep.subr.mxu0 %v3574_v13 }
 0x64b   : > { %v1047_v1 = vpop.f32.mrb[4].mxu1 }
 0x64c   : > { %v3292_v2 = vpop.f32.mrb[5].mxu1 }
 0x64f   : > { %v974_v3 = vpop.f32.mrb[6].mxu0 }
 0x650   : > { %v1048_v4 = vadd.f32 %v1047_v1, %v974_v3  ;;  %v3287_v5 = vpop.f32.mrb[7].mxu0  ;;  %v455_v1 = vld [vmem:[%s4089_s7 + $0x18] sm:$0xff]  ;;  %v456_v3 = vld [vmem:[%s4089_s7 + $0x20] sm:$0xff] }
 0x651   : > { %v3470_v2 = vpack.c.bf16 %v455_v1, %v454_v62 }
 0x653   : > { %v1125_v6 = vpop.f32.mrb[8].mxu0 }
 0x654   : > { %v3297_v7 = vpop.f32.mrb[9].mxu0  ;;  %v1129_v8 = vsel %vm577_vm2, %v1125_v6, -inf }
 0x655   : > { %1130 = vmax.xlane.f32.xlu1 %v1129_v8 }
 0x666   : > { %1140 = vrot.lane.b32.xlu1 %v3710_v26, %s4098_s28 }
 0x66a   : > { %1290 = vrot.lane.b32.xlu1 %v3715_v28, %s4099_s29 }
 0x6e2   : > { %v1131_v9 = vpop.xlane.xlu1 %1130 }
 0x6e3   : > { %v1132_v11 = vsub.f32 %v1125_v6, %v1131_v9 }
 0x6e5   : > { %v1133_v12 = vmul.f32 1.442695, %v1132_v11  ;;  %v3103_v11 = vld [vmem:[%s4093_s11] ss:$0 sm:$0xff] }
 0x6e6   : > { %v1141_v14 = vpop.permute.xlu1 %1140 }
 0x6e7   : > { %3534 = vpow2.f32 %v1133_v12  ;;  %3299 = vmatpush3.msra.mxu1 %v1141_v14  ;;  %v3104_v14 = vld [vmem:[%s4094_s12] ss:$0 sm:$0xff] }
 0x6e8   : > { %3308 = vmatprep.subr.mxu1 %v3574_v13 }
 0x6ea   : > { %v1291_v21 = vpop.permute.xlu1 %1290 }
 0x6f1   : > { %v3535_v15 = vpop.eup %3534 }
 0x6f2   : > { %v1135_v16 = vsel %vm577_vm2, %v3535_v15, 0.0 }
 0x6f3   : > { %1136 = vadd.xlane.f32.xlu0 %v1135_v16 }
 0x709   : > { %1292 = vrot.lane.b32.xlu0 %v3710_v26, %s4100_s30 }
 0x780   : > { %v1137_v17 = vpop.xlane.xlu0 %1136 }
 0x781   : > { %3536 = vrcp.f32 %v1137_v17  ;;  %v458_v17 = vld [vmem:[%s4089_s7 + $0x30] sm:$0xff] }
 0x784   : > { %v1293_v20 = vpop.permute.xlu0 %1292 }
 0x78b   : > { %v3537_v18 = vpop.eup %3536 }
 0x78c   : > { %v1139_v19 = vmul.f32 %v3537_v18, %v3535_v15  ;;  %v459_v18 = vld [vmem:[%s4089_s7 + $0x38] sm:$0xff] }
 0x78e   : > { %3301 = vmatmul.mubr.msk.f32.vlgmr.msra.gmra.mrb[6].mxu1 %vm577_vm2, %v1139_v19  ;;  %v3476_v19 = vpack.c.bf16 %v459_v18, %v458_v17 }
 0x78f   : > { %3309 = vmatpush3.xpose.msk.msra.mxu1 %vm577_vm2, %v1293_v20  ;;  %3310 = vmatprep.mubr.msk.f32.mxu1 %vm3573_vm1, %v3574_v13  ;;  %v3105_v20 = vld [vmem:[%s4088_s6] ss:$0 sm:$0xff] }
 0x790   : > { %3318 = vmatprep.subr.mxu1 %v3574_v13 }
 0x792   : > { %3311 = vmatmul.mubr.msk.f32.vlgmr.msra.gmra.mrb[8].mxu1 %vm577_vm2, %v1291_v21 }
 0x793   : > { %3320 = vmatprep.mubr.msk.f32.mxu1 %vm3573_vm1, %v3574_v13  ;;  %3319 = vmatpush3.msra.mxu1 %v445_v34 }
 0x794   : > { %3466 = vmatprep.subr.bf16.mxu1 %v3572_v10 }
 0x861   : > { %v1212_v23 = vpop.f32.mrb[6].mxu1 }
 0x862   : > { %v3302_v24 = vpop.f32.mrb[7].mxu1  ;;  %3306 = vmatmul.mubr.msk.f32.vlgmr.msra.gmra.mrb[10].mxu0 %vm577_vm2, %v1212_v23 }
 0x863   : > { %3315 = vmatprep.mubr.msk.f32.mxu0 %vm3573_vm1, %v3574_v13 }
 0x865   : > { %v1364_v25 = vpop.f32.mrb[8].mxu1 }
 0x866   : > { %v3312_v27 = vpop.f32.mrb[9].mxu1  ;;  %v1368_v28 = vsel %vm577_vm2, %v1364_v25, -inf }
 0x867   : > { %1369 = vmax.xlane.f32.xlu1 %v1368_v28 }
 0x8f4   : > { %v1370_v29 = vpop.xlane.xlu1 %1369 }
 0x8f5   : > { %v1371_v30 = vsub.f32 %v1364_v25, %v1370_v29  ;;  %v3107_v25 = vld [vmem:[%s4090_s8] ss:$0 sm:$0xff] }
 0x8f7   : > { %v1372_v31 = vmul.f32 1.442695, %v1371_v30 }
 0x8f9   : > { %3538 = vpow2.f32 %v1372_v31 }
 0x903   : > { %v3539_v32 = vpop.eup %3538 }
 0x904   : > { %v1374_v33 = vsel %vm577_vm2, %v3539_v32, 0.0 }
 0x905   : > { %1375 = vadd.xlane.f32.xlu0 %v1374_v33 }
 0x91b   : > { %1379 = vrot.lane.b32.xlu0 %v3710_v26, %s4097_s23  ;;  %s4106_s23 = smov 40  }
 0x935   : > { %v1285_v35 = vpop.f32.mrb[10].mxu0 }
 0x936   : > { %v1289_v36 = vadd.f32 %v1285_v35, %v1048_v4  ;;  %v3307_v37 = vpop.f32.mrb[11].mxu0  ;;  %v457_v4 = vld [vmem:[%s4089_s7 + $0x28] sm:$0xff] }
 0x937   : > { %v3473_v5 = vpack.c.bf16 %v457_v4, %v456_v3  ;;  %v3109_v37 = vld [vmem:[%s4083_s1 + $0x20] sm:$0xff] }
 0x992   : > { %v1376_v38 = vpop.xlane.xlu0 %1375 }
 0x993   : > { %3540 = vrcp.f32 %v1376_v38  ;;  %v3110_v38 = vld [vmem:[%s4083_s1 + $0x28] sm:$0xff] }
 0x996   : > { %v1380_v39 = vpop.permute.xlu0 %1379 }
 0x997   : > { %3314 = vmatpush3.msra.mxu0 %v1380_v39  ;;  %v3479_v39 = vpack.c.bf16 %v3110_v38, %v3109_v37 }
 0x998   : > { %3460 = vmatprep.subr.bf16.mxu0 %v3572_v10 }
 0x99d   : > { %v3541_v40 = vpop.eup %3540 }
 0x99e   : > { %v1378_v41 = vmul.f32 %v3541_v40, %v3539_v32  ;;  %v3111_v40 = vld [vmem:[%s4083_s1 + $0x30] sm:$0xff] }
 0x9a0   : > { %3316 = vmatmul.mubr.msk.f32.vlgmr.msra.gmra.mrb[12].mxu0 %vm577_vm2, %v1378_v41  ;;  %v3112_v41 = vld [vmem:[%s4083_s1 + $0x38] sm:$0xff] }
 0x9a1   : > { %3331 = vmatprep.mubr.msk.f32.mxu0 %vm3573_vm1, %v3574_v13 }
 0xa73   : > { %v1451_v26 = vpop.f32.mrb[12].mxu0 }
 0xa74   : > { %v3317_v42 = vpop.f32.mrb[13].mxu0  ;;  %3321 = vmatmul.mubr.msk.f32.vlgmr.msra.gmra.mrb[10].mxu1 %vm577_vm2, %v1451_v26  ;;  %v3482_v26 = vpack.c.bf16 %v3112_v41, %v3111_v40 }
 0xa75   : > { %3350 = vmatprep.mubr.msk.f32.mxu1 %vm3573_vm1, %v3574_v13  ;;  %3468 = vmatpush3.bf16.msra.mxu1 %v3467_v63 }
 0xa76   : > { %3469 = vmatprep.subr.bf16.mxu1 %v3572_v10 }
 0xa79   : > { %3471 = vmatpush3.bf16.msra.mxu1 %v3470_v2 }
 0xa7a   : > { %3472 = vmatprep.subr.bf16.mxu1 %v3572_v10 }
 0xa7d   : > { %3474 = vmatpush3.bf16.msra.mxu1 %v3473_v5 }
 0xa7e   : > { %3475 = vmatprep.subr.bf16.mxu1 %v3572_v10 }
 0xa81   : > { %3477 = vmatpush3.bf16.msra.mxu1 %v3476_v19 }
 0xa82   : > { %3369 = vmatprep.subr.mxu1 %v3574_v13 }
 0xb47   : > { %v1524_v44 = vpop.f32.mrb[10].mxu1 }
 0xb48   : > { %v1528_v45 = vadd.f32 %v1524_v44, %v1289_v36  ;;  %v3322_v46 = vpop.f32.mrb[11].mxu1 }
 0xb49   : > { %v3137_v46 = vld [vmem:[%s4091_s9 + $0x1] ss:$0 sm:$0xff] }
 0xb4a   : > { %v1535_v47 = vadd.f32 %v3102_v43, %v1528_v45 }
 0xb4c   : > { %v3814_v48 = vadd.f32 %v1535_v47, %v3672_v0  ;;  %v448_v0 = vld [vmem:[%s4087_s5 + $0x8] sm:$0xff] }
 0xb4d   : > { %v3461_v56 = vpack.c.bf16 %v448_v0, %v447_v55 }
 0xb4e   : > { %v1537_v49 = vsel %vm465_vm0, %v3814_v48, 0.0 }
 0xb4f   : > { %1538 = vadd.xlane.f32.xlu1 %v1537_v49  ;;  %3462 = vmatpush3.bf16.msra.mxu0 %v3461_v56 }
 0xb50   : > { %3463 = vmatprep.subr.bf16.mxu0 %v3572_v10 }
 0xb53   : > { %3465 = vmatpush3.bf16.msra.mxu0 %v3464_v59 }
 0xb54   : > { %3478 = vmatprep.subr.bf16.mxu0 %v3572_v10 }
 0xbdc   : > { %v1539_v50 = vpop.xlane.xlu1 %1538 }
 0xbdd   : > { %v1540_v51 = vmul.f32 0.03125, %v1539_v50 }
 0xbdf   : > { %v1541_v52 = vsub.f32 %v3814_v48, %v1540_v51  ;;  %v3139_v51 = vld [vmem:[%s4084_s2 + $0x1] ss:$0 sm:$0xff] }
 0xbe1   : > { %v1542_v53 = vmul.f32 %v1541_v52, %v1541_v52 }
 0xbe3   : > { %v1543_v54 = vsel %vm465_vm0, %v1542_v53, 0.0 }
 0xbe4   : > { %1544 = vadd.xlane.f32.xlu1 %v1543_v54 }
 0xc71   : > { %v1545_v6 = vpop.xlane.xlu1 %1544 }
 0xc72   : > { %v1546_v7 = vmul.f32 0.03125, %v1545_v6 }
 0xc74   : > { %v1547_v8 = vadd.f32 1e-05, %v1546_v7 }
 0xc76   : > { %3542 = vrsqrt.f32 %v1547_v8 }
 0xc80   : > { %v3543_v9 = vpop.eup %3542 }
 0xc81   : > { %v1549_v12 = vmul.f32 %v3543_v9, %v1541_v52 }
 0xc83   : > { %v1556_v15 = vmul.f32 %v3103_v11, %v1549_v12  ;;  %v3115_v12 = vld [vmem:[%s4085_s3 + $0x28] sm:$0xff] }
 0xc85   : > { %v1563_v16 = vadd.f32 %v3104_v14, %v1556_v15 }
 0xc87   : > { %3332 = vmatmul.mubr.msk.f32.vlgmr.msra.gmra.mrb[14].mxu0 %vm465_vm0, %v1563_v16 }
 0xc88   : > { %3361 = vmatprep.mubr.msk.f32.mxu0 %vm3573_vm1, %v3574_v13  ;;  %3480 = vmatpush3.bf16.msra.mxu0 %v3479_v39 }
 0xc89   : > { %3481 = vmatprep.subr.bf16.mxu0 %v3572_v10 }
 0xc8c   : > { %3483 = vmatpush3.bf16.msra.mxu0 %v3482_v26 }
 0xc8d   : > { %3364 = vmatprep.subr.mxu0 %v3574_v13 }
 0xd5a   : > { %v1639_v21 = vpop.f32.mrb[14].mxu0 }
 0xd5b   : > { %v1640_v22 = vadd.f32 %v3105_v20, %v1639_v21  ;;  %v3333_v23 = vpop.f32.mrb[15].mxu0 }
 0xd5d   : > { %v1643_v24 = vmax.f32 %v1640_v22, 0.0  ;;  %v3114_v22 = vld [vmem:[%s4085_s3 + $0x20] sm:$0xff] }
 0xd5f   : > { %3351 = vmatmul.mubr.msk.f32.vlgmr.msra.gmra.mrb[12].mxu1 %vm1650_vm3, %v1643_v24 }
 0xd60   : > { %3371 = vmatprep.mubr.msk.f32.mxu1 %vm3573_vm1, %v3574_v13 }
 0xe32   : > { %v1720_v27 = vpop.f32.mrb[12].mxu1 }
 0xe33   : > { %v1721_v28 = vadd.f32 %v3107_v25, %v1720_v27  ;;  %v3352_v29 = vpop.f32.mrb[13].mxu1 }
 0xe35   : > { %v3881_v30 = vadd.f32 %v1721_v28, %v3814_v48  ;;  %v3138_v48 = vld [vmem:[%s4092_s10 + $0x1] ss:$0 sm:$0xff] }
 0xe37   : > { %v1765_v31 = vsel %vm465_vm0, %v3881_v30, 0.0 }
 0xe38   : > { %1766 = vadd.xlane.f32.xlu1 %v1765_v31 }
 0xec5   : > { %v1767_v32 = vpop.xlane.xlu1 %1766 }
 0xec6   : > { %v1768_v33 = vmul.f32 0.03125, %v1767_v32 }
 0xec8   : > { %v1769_v34 = vsub.f32 %v3881_v30, %v1768_v33 }
 0xeca   : > { %v1770_v35 = vmul.f32 %v1769_v34, %v1769_v34 }
 0xecc   : > { %v1771_v36 = vsel %vm465_vm0, %v1770_v35, 0.0 }
 0xecd   : > { %1772 = vadd.xlane.f32.xlu1 %v1771_v36 }
 0xf5a   : > { %v1773_v42 = vpop.xlane.xlu1 %1772 }
 0xf5b   : > { %v1774_v43 = vmul.f32 0.03125, %v1773_v42 }
 0xf5d   : > { %v1775_v44 = vadd.f32 1e-05, %v1774_v43 }
 0xf5f   : > { %3544 = vrsqrt.f32 %v1775_v44 }
 0xf69   : > { %v3545_v45 = vpop.eup %3544 }
 0xf6a   : > { %v1777_v47 = vmul.f32 %v3545_v45, %v1769_v34 }
 0xf6c   : > { %v1784_v49 = vmul.f32 %v3137_v46, %v1777_v47 }
 0xf6e   : > { %v1791_v50 = vadd.f32 %v3138_v48, %v1784_v49  ;;  %v3116_v49 = vld [vmem:[%s4085_s3 + $0x30] sm:$0xff] }
 0xf70   : > { %3362 = vmatmul.mubr.msk.f32.vlgmr.msra.gmra.mrb[16].mxu0 %vm465_vm0, %v1791_v50 }
 0xf71   : > { %3366 = vmatprep.mubr.msk.f32.mxu0 %vm3573_vm1, %v3574_v13 }
0x1043   : > { %v1867_v52 = vpop.f32.mrb[16].mxu0 }
0x1044   : > { %v3913_v53 = vadd.f32 %v3139_v51, %v1867_v52  ;;  %v3363_v54 = vpop.f32.mrb[17].mxu0 }
0x1046   : > { %2039 = vrot.lane.b32.xlu0 %v3913_v53, %s3577_s16  ;;  %1873 = vrot.lane.b32.xlu1 %v3913_v53, %s3575_s14  ;;  %v3920_v55 = vmul.f32 9.094947e-13, %v3913_v53  ;;  %s4102_s14 = smov 112   ;;  %s4107_s16 = sshll.u32 %s4109_s26, 3 }
0x104a   : > { %2037 = vrot.lane.b32.xlu0 %v3920_v55, %s3576_s15 }
0x10b8   : > { %v1874_v0 = vpop.permute.xlu1 %1873  ;;  %v2040_v56 = vpop.permute.xlu0 %2039 }
0x10b9   : > { %3365 = vmatpush3.xpose.msk.msra.mxu0 %vm577_vm2, %v1874_v0 }
0x10ba   : > { %3374 = vmatprep.subr.mxu0 %v3574_v13 }
0x10bc   : > { %3367 = vmatmul.mubr.msk.f32.vlgmr.msra.gmra.mrb[18].mxu0 %vm577_vm2, %v3920_v55  ;;  %v2038_v57 = vpop.permute.xlu0 %2037 }
0x10bd   : > { %3375 = vmatpush3.xpose.msk.msra.mxu0 %vm577_vm2, %v2040_v56  ;;  %3376 = vmatprep.mubr.msk.f32.mxu0 %vm3573_vm1, %v3574_v13 }
0x10be   : > { %3384 = vmatprep.subr.mxu0 %v3574_v13 }
0x10c0   : > { %3377 = vmatmul.mubr.msk.f32.vlgmr.msra.gmra.mrb[20].mxu0 %vm577_vm2, %v2038_v57 }
0x10c1   : > { %3386 = vmatprep.mubr.msk.f32.mxu0 %vm3573_vm1, %v3574_v13  ;;  %3385 = vmatpush3.msra.mxu0 %v3115_v12 }
0x10c2   : > { %3394 = vmatprep.subr.mxu0 %v3574_v13 }
0x118f   : > { %v1946_v58 = vpop.f32.mrb[18].mxu0 }
0x1190   : > { %v3368_v59 = vpop.f32.mrb[19].mxu0  ;;  %v1950_v60 = vsel %vm577_vm2, %v1946_v58, -inf }
0x1191   : > { %1951 = vmax.xlane.f32.xlu0 %v1950_v60 }
0x1193   : > { %v2111_v61 = vpop.f32.mrb[20].mxu0 }
0x1194   : > { %v3378_v62 = vpop.f32.mrb[21].mxu0  ;;  %v2115_v63 = vsel %vm577_vm2, %v2111_v61, -inf }
0x1195   : > { %2116 = vmax.xlane.f32.xlu1 %v2115_v63 }
0x11a6   : > { %2126 = vrot.lane.b32.xlu1 %v3913_v53, %s3578_s17 }
0x11aa   : > { %2350 = vrot.lane.b32.xlu1 %v3913_v53, %s3580_s19  ;;  %s4103_s19 = smov 72  }
0x121e   : > { %v1952_v1 = vpop.xlane.xlu0 %1951 }
0x121f   : > { %v1953_v2 = vsub.f32 %v1946_v58, %v1952_v1 }
0x1221   : > { %v1954_v3 = vmul.f32 1.442695, %v1953_v2 }
0x1222   : > { %v2117_v4 = vpop.xlane.xlu1 %2116 }
0x1223   : > { %3546 = vpow2.f32 %v1954_v3  ;;  %v2118_v5 = vsub.f32 %v2111_v61, %v2117_v4  ;;  %v3117_v61 = vld [vmem:[%s4085_s3 + $0x38] sm:$0xff] }
0x1225   : > { %v2119_v6 = vmul.f32 1.442695, %v2118_v5 }
0x1226   : > { %v2127_v19 = vpop.permute.xlu1 %2126 }
0x1227   : > { %3548 = vpow2.f32 %v2119_v6  ;;  %v3157_v6 = vld [vmem:[%s4086_s4 + $0x1] ss:$0 sm:$0xff] }
0x122a   : > { %v2351_v27 = vpop.permute.xlu1 %2350 }
0x122d   : > { %v3547_v7 = vpop.eup %3546 }
0x122e   : > { %v1956_v8 = vsel %vm577_vm2, %v3547_v7, 0.0 }
0x122f   : > { %1957 = vadd.xlane.f32.xlu0 %v1956_v8 }
0x1231   : > { %v3549_v9 = vpop.eup %3548 }
0x1232   : > { %v2121_v11 = vsel %vm577_vm2, %v3549_v9, 0.0 }
0x1233   : > { %2122 = vadd.xlane.f32.xlu0 %v2121_v11 }
0x1249   : > { %1961 = vrot.lane.b32.xlu0 %v3913_v53, %s3579_s18 }
0x124d   : > { %2348 = vrot.lane.b32.xlu0 %v3920_v55, %s4102_s14 }
0x12bc   : > { %v1958_v14 = vpop.xlane.xlu0 %1957 }
0x12bd   : > { %3550 = vrcp.f32 %v1958_v14 }
0x12c0   : > { %v2123_v15 = vpop.xlane.xlu0 %2122 }
0x12c1   : > { %3552 = vrcp.f32 %v2123_v15 }
0x12c4   : > { %v1962_v16 = vpop.permute.xlu0 %1961 }
0x12c5   : > { %3370 = vmatpush3.msra.mxu1 %v1962_v16 }
0x12c6   : > { %3379 = vmatprep.subr.mxu1 %v3574_v13 }
0x12c7   : > { %v3551_v17 = vpop.eup %3550 }
0x12c8   : > { %v1960_v18 = vmul.f32 %v3551_v17, %v3547_v7  ;;  %v2349_v29 = vpop.permute.xlu0 %2348 }
0x12ca   : > { %3372 = vmatmul.mubr.msk.f32.vlgmr.msra.gmra.mrb[14].mxu1 %vm577_vm2, %v1960_v18 }
0x12cb   : > { %v3553_v20 = vpop.eup %3552  ;;  %3380 = vmatpush3.msra.mxu1 %v2127_v19  ;;  %3381 = vmatprep.mubr.msk.f32.mxu1 %vm3573_vm1, %v3574_v13 }
0x12cc   : > { %v2125_v21 = vmul.f32 %v3553_v20, %v3549_v9  ;;  %3389 = vmatprep.subr.mxu1 %v3574_v13  ;;  %v3120_v20 = vld [vmem:[%s4087_s5 + $0x28] sm:$0xff] }
0x12ce   : > { %3382 = vmatmul.mubr.msk.f32.vlgmr.msra.gmra.mrb[16].mxu1 %vm577_vm2, %v2125_v21 }
0x12cf   : > { %3391 = vmatprep.mubr.msk.f32.mxu1 %vm3573_vm1, %v3574_v13  ;;  %3390 = vmatpush3.msra.mxu1 %v3114_v22  ;;  %v3122_v22 = vld [vmem:[%s4087_s5 + $0x38] sm:$0xff] }
0x12d0   : > { %3399 = vmatprep.subr.mxu1 %v3574_v13 }
0x139d   : > { %v2033_v23 = vpop.f32.mrb[14].mxu1 }
0x139e   : > { %v3373_v24 = vpop.f32.mrb[15].mxu1  ;;  %3392 = vmatmul.mubr.msk.f32.vlgmr.msra.gmra.mrb[18].mxu1 %vm577_vm2, %v2033_v23 }
0x139f   : > { %3401 = vmatprep.mubr.msk.f32.mxu1 %vm3573_vm1, %v3574_v13  ;;  %v3124_v24 = vld [vmem:[%s4089_s7 + $0x40] sm:$0xff] }
0x13a1   : > { %v2198_v25 = vpop.f32.mrb[16].mxu1 }
0x13a2   : > { %v3383_v28 = vpop.f32.mrb[17].mxu1  ;;  %3387 = vmatmul.mubr.msk.f32.vlgmr.msra.gmra.mrb[22].mxu0 %vm577_vm2, %v2198_v25  ;;  %v3125_v25 = vld [vmem:[%s4089_s7 + $0x48] sm:$0xff] }
0x13a3   : > { %3395 = vmatpush3.xpose.msk.msra.mxu0 %vm577_vm2, %v2351_v27  ;;  %3396 = vmatprep.mubr.msk.f32.mxu0 %vm3573_vm1, %v3574_v13  ;;  %v3126_v27 = vld [vmem:[%s4089_s7 + $0x50] sm:$0xff]  ;;  %v3491_v28 = vpack.c.bf16 %v3125_v25, %v3124_v24 }
0x13a4   : > { %3404 = vmatprep.subr.mxu0 %v3574_v13 }
0x13a6   : > { %3397 = vmatmul.mubr.msk.f32.vlgmr.msra.gmra.mrb[24].mxu0 %vm577_vm2, %v2349_v29  ;;  %v3127_v29 = vld [vmem:[%s4089_s7 + $0x58] sm:$0xff] }
0x13a7   : > { %3406 = vmatprep.mubr.msk.f32.mxu0 %vm3573_vm1, %v3574_v13  ;;  %3405 = vmatpush3.msra.mxu0 %v3116_v49 }
0x13a8   : > { %3414 = vmatprep.subr.mxu0 %v3574_v13 }
0x1471   : > { %v2344_v31 = vpop.f32.mrb[18].mxu1 }
0x1472   : > { %v3393_v32 = vpop.f32.mrb[19].mxu1 }
0x1473   : > { %v3128_v32 = vld [vmem:[%s4089_s7 + $0x60] sm:$0xff] }
0x1475   : > { %v2271_v33 = vpop.f32.mrb[22].mxu0 }
0x1476   : > { %v2345_v34 = vadd.f32 %v2344_v31, %v2271_v33  ;;  %v3388_v35 = vpop.f32.mrb[23].mxu0  ;;  %v3494_v31 = vpack.c.bf16 %v3127_v29, %v3126_v27  ;;  %v3129_v33 = vld [vmem:[%s4089_s7 + $0x68] sm:$0xff] }
0x1479   : > { %v2422_v36 = vpop.f32.mrb[24].mxu0 }
0x147a   : > { %v3398_v37 = vpop.f32.mrb[25].mxu0  ;;  %v2426_v38 = vsel %vm577_vm2, %v2422_v36, -inf }
0x147b   : > { %2427 = vmax.xlane.f32.xlu1 %v2426_v38 }
0x148c   : > { %2589 = vrot.lane.b32.xlu1 %v3913_v53, %s4103_s19  ;;  %s435_s19 = scalar_lea.vmem %s4095_s13, %s4107_s16 }
0x1490   : > { %2587 = vrot.lane.b32.xlu1 %v3920_v55, %s4104_s27 }
0x1508   : > { %v2428_v39 = vpop.xlane.xlu1 %2427 }
0x1509   : > { %v2429_v40 = vsub.f32 %v2422_v36, %v2428_v39  ;;  %v3158_v39 = vld [vmem:[%s4093_s11 + $0x1] ss:$0 sm:$0xff] }
0x150b   : > { %v2430_v41 = vmul.f32 1.442695, %v2429_v40 }
0x150c   : > { %v2590_v46 = vpop.permute.xlu1 %2589 }
0x150d   : > { %3554 = vpow2.f32 %v2430_v41  ;;  %v3159_v41 = vld [vmem:[%s4094_s12 + $0x1] ss:$0 sm:$0xff] }
0x1510   : > { %v2588_v48 = vpop.permute.xlu1 %2587 }
0x1517   : > { %v3555_v26 = vpop.eup %3554 }
0x1518   : > { %v2432_v42 = vsel %vm577_vm2, %v3555_v26, 0.0 }
0x1519   : > { %2433 = vadd.xlane.f32.xlu0 %v2432_v42 }
0x152f   : > { %2437 = vrot.lane.b32.xlu0 %v3913_v53, %s4105_s24 }
0x15a6   : > { %v2434_v43 = vpop.xlane.xlu0 %2433 }
0x15a7   : > { %3556 = vrcp.f32 %v2434_v43  ;;  %v3131_v43 = vld [vmem:[%s4089_s7 + $0x78] sm:$0xff] }
0x15aa   : > { %v2438_v44 = vpop.permute.xlu0 %2437 }
0x15ab   : > { %3400 = vmatpush3.msra.mxu1 %v2438_v44 }
0x15ac   : > { %3409 = vmatprep.subr.mxu1 %v3574_v13 }
0x15b1   : > { %v3557_v45 = vpop.eup %3556 }
0x15b2   : > { %v2436_v47 = vmul.f32 %v3557_v45, %v3555_v26  ;;  %v3160_v45 = vld [vmem:[%s4088_s6 + $0x1] ss:$0 sm:$0xff] }
0x15b4   : > { %3402 = vmatmul.mubr.msk.f32.vlgmr.msra.gmra.mrb[20].mxu1 %vm577_vm2, %v2436_v47 }
0x15b5   : > { %3410 = vmatpush3.xpose.msk.msra.mxu1 %vm577_vm2, %v2590_v46  ;;  %3411 = vmatprep.mubr.msk.f32.mxu1 %vm3573_vm1, %v3574_v13 }
0x15b6   : > { %3419 = vmatprep.subr.mxu1 %v3574_v13 }
0x15b8   : > { %3412 = vmatmul.mubr.msk.f32.vlgmr.msra.gmra.mrb[22].mxu1 %vm577_vm2, %v2588_v48 }
0x15b9   : > { %3421 = vmatprep.mubr.msk.f32.mxu1 %vm3573_vm1, %v3574_v13  ;;  %3420 = vmatpush3.msra.mxu1 %v3117_v61 }
0x15ba   : > { %3490 = vmatprep.subr.bf16.mxu1 %v3572_v10 }
0x1687   : > { %v2509_v50 = vpop.f32.mrb[20].mxu1 }
0x1688   : > { %v3403_v51 = vpop.f32.mrb[21].mxu1  ;;  %3407 = vmatmul.mubr.msk.f32.vlgmr.msra.gmra.mrb[26].mxu0 %vm577_vm2, %v2509_v50  ;;  %v3162_v50 = vld [vmem:[%s4090_s8 + $0x1] ss:$0 sm:$0xff] }
0x1689   : > { %3416 = vmatprep.mubr.msk.f32.mxu0 %vm3573_vm1, %v3574_v13 }
0x168b   : > { %v2661_v52 = vpop.f32.mrb[22].mxu1 }
0x168c   : > { %v3413_v54 = vpop.f32.mrb[23].mxu1  ;;  %v2665_v55 = vsel %vm577_vm2, %v2661_v52, -inf }
0x168d   : > { %2666 = vmax.xlane.f32.xlu0 %v2665_v55 }
0x16a3   : > { %2676 = vrot.lane.b32.xlu0 %v3913_v53, %s4106_s23 }
0x171a   : > { %v2667_v0 = vpop.xlane.xlu0 %2666 }
0x171b   : > { %v2668_v56 = vsub.f32 %v2661_v52, %v2667_v0 }
0x171d   : > { %v2669_v57 = vmul.f32 1.442695, %v2668_v56 }
0x171e   : > { %v2677_v58 = vpop.permute.xlu0 %2676 }
0x171f   : > { %3558 = vpow2.f32 %v2669_v57  ;;  %3415 = vmatpush3.msra.mxu0 %v2677_v58 }
0x1720   : > { %3484 = vmatprep.subr.bf16.mxu0 %v3572_v10 }
0x1729   : > { %v3559_v59 = vpop.eup %3558 }
0x172a   : > { %v2671_v60 = vsel %vm577_vm2, %v3559_v59, 0.0 }
0x172b   : > { %2672 = vadd.xlane.f32.xlu1 %v2671_v60 }
0x175b   : > { %v2582_v53 = vpop.f32.mrb[26].mxu0 }
0x175c   : > { %v2586_v62 = vadd.f32 %v2582_v53, %v2345_v34  ;;  %v3408_v63 = vpop.f32.mrb[27].mxu0  ;;  %v3497_v34 = vpack.c.bf16 %v3129_v33, %v3128_v32 }
0x17b8   : > { %v2673_v1 = vpop.xlane.xlu1 %2672 }
0x17b9   : > { %3560 = vrcp.f32 %v2673_v1 }
0x17c3   : > { %v3561_v2 = vpop.eup %3560 }
0x17c4   : > { %v2675_v3 = vmul.f32 %v3561_v2, %v3559_v59 }
0x17c6   : > { %3417 = vmatmul.mubr.msk.f32.vlgmr.msra.gmra.mrb[28].mxu0 %vm577_vm2, %v2675_v3 }
0x17c7   : > { %3432 = vmatprep.mubr.msk.f32.mxu0 %vm3573_vm1, %v3574_v13 }
0x1899   : > { %v2748_v4 = vpop.f32.mrb[28].mxu0 }
0x189a   : > { %v3418_v5 = vpop.f32.mrb[29].mxu0  ;;  %3422 = vmatmul.mubr.msk.f32.vlgmr.msra.gmra.mrb[24].mxu1 %vm577_vm2, %v2748_v4 }
0x189b   : > { %3451 = vmatprep.mubr.msk.f32.mxu1 %vm3573_vm1, %v3574_v13  ;;  %v3119_v13 = vld [vmem:[%s4087_s5 + $0x20] sm:$0xff]  ;;  %3492 = vmatpush3.bf16.msra.mxu1 %v3491_v28 }
0x189c   : > { %v3485_v21 = vpack.c.bf16 %v3120_v20, %v3119_v13  ;;  %3493 = vmatprep.subr.bf16.mxu1 %v3572_v10 }
0x189e   : > { %3486 = vmatpush3.bf16.msra.mxu0 %v3485_v21 }
0x189f   : > { %3487 = vmatprep.subr.bf16.mxu0 %v3572_v10  ;;  %3495 = vmatpush3.bf16.msra.mxu1 %v3494_v31 }
0x18a0   : > { %3496 = vmatprep.subr.bf16.mxu1 %v3572_v10 }
0x18a3   : > { %3498 = vmatpush3.bf16.msra.mxu1 %v3497_v34 }
0x18a4   : > { %3499 = vmatprep.subr.bf16.mxu1 %v3572_v10  ;;  %v3130_v10 = vld [vmem:[%s4089_s7 + $0x70] sm:$0xff] }
0x18a5   : > { %v3500_v44 = vpack.c.bf16 %v3131_v43, %v3130_v10 }
0x18a7   : > { %3501 = vmatpush3.bf16.msra.mxu1 %v3500_v44 }
0x196d   : > { %v2821_v7 = vpop.f32.mrb[24].mxu1 }
0x196e   : > { %v2825_v8 = vadd.f32 %v2821_v7, %v2586_v62  ;;  %v3423_v9 = vpop.f32.mrb[25].mxu1 }
0x1970   : > { %v2832_v11 = vadd.f32 %v3157_v6, %v2825_v8 }
0x1972   : > { %v2833_v12 = vadd.f32 %v2832_v11, %v3881_v30  ;;  %v3121_v30 = vld [vmem:[%s4087_s5 + $0x30] sm:$0xff] }
0x1973   : > { %v3488_v23 = vpack.c.bf16 %v3122_v22, %v3121_v30 }
0x1974   : > { %v2834_v14 = vsel %vm465_vm0, %v2833_v12, 0.0 }
0x1975   : > { %2835 = vadd.xlane.f32.xlu1 %v2834_v14  ;;  %3489 = vmatpush3.bf16.msra.mxu0 %v3488_v23 }
0x1a02   : > { %v2836_v15 = vpop.xlane.xlu1 %2835 }
0x1a03   : > { %v2837_v16 = vmul.f32 0.03125, %v2836_v15 }
0x1a05   : > { %v2838_v17 = vsub.f32 %v2833_v12, %v2837_v16 }
0x1a07   : > { %v2839_v18 = vmul.f32 %v2838_v17, %v2838_v17 }
0x1a09   : > { %v2840_v19 = vsel %vm465_vm0, %v2839_v18, 0.0 }
0x1a0a   : > { %2841 = vadd.xlane.f32.xlu1 %v2840_v19 }
0x1a97   : > { %v2842_v35 = vpop.xlane.xlu1 %2841 }
0x1a98   : > { %v2843_v36 = vmul.f32 0.03125, %v2842_v35 }
0x1a9a   : > { %v2844_v37 = vadd.f32 1e-05, %v2843_v36 }
0x1a9c   : > { %3562 = vrsqrt.f32 %v2844_v37 }
0x1aa6   : > { %v3563_v38 = vpop.eup %3562 }
0x1aa7   : > { %v2846_v40 = vmul.f32 %v3563_v38, %v2838_v17 }
0x1aa9   : > { %v2853_v26 = vmul.f32 %v3158_v39, %v2846_v40 }
0x1aab   : > { %v2860_v42 = vadd.f32 %v3159_v41, %v2853_v26 }
0x1aad   : > { %3433 = vmatmul.mubr.msk.f32.vlgmr.msra.gmra.mrb[30].mxu0 %vm465_vm0, %v2860_v42 }
0x1b80   : > { %v2936_v46 = vpop.f32.mrb[30].mxu0 }
0x1b81   : > { %v2937_v47 = vadd.f32 %v3160_v45, %v2936_v46  ;;  %v3434_v48 = vpop.f32.mrb[31].mxu0 }
0x1b83   : > { %v2940_v49 = vmax.f32 %v2937_v47, 0.0 }
0x1b85   : > { %3452 = vmatmul.mubr.msk.f32.vlgmr.msra.gmra.mrb[26].mxu1 %vm1650_vm3, %v2940_v49 }
0x1c58   : > { %v3016_v51 = vpop.f32.mrb[26].mxu1 }
0x1c59   : > { %v3017_v52 = vadd.f32 %v3162_v50, %v3016_v51  ;;  %v3453_v54 = vpop.f32.mrb[27].mxu1 }
0x1c5b   : > { %v3020_v55 = vadd.f32 %v3017_v52, %v2833_v12 }
0x1c5d   : > { %3021 = vst.msk [vmem:[%s435_s19] sm:$0xff] %vm465_vm0, %v3020_v55 }
0x1c5e PF: > { %s23_s25 = sadd.s32 1, %s3570_s25  }
0x1c5f   : > { %p20_p4 = scmp.ge.s32.totalorder %s23_s25, 4  }
0x1c61   :  { %22 = sbr.rel (!%p20_p4) target bundleno = 1 (0x1), region = 114 }

</bundles_post_ra>
